<compile_context>
chip_gen: v5e
topology: v5e:2x2
jax: 0.10.0
libtpu: 0.0.40
codegen_flags: <defaults>
</compile_context>

<pallas_src>
import jax
import jax.numpy as jnp
from jax.experimental import pallas as pl
from jax.experimental.pallas import tpu as pltpu


def _make_widedeep_kernel(n_layers: int):
    """Fused kernel: wide linear + deep MLP (BN applied in f32) + output head + sigmoid."""
    # Contract last dims of both operands: A (8, D) x B (bt, D)^T -> (8, bt) lane-dense.
    nt_dims = (((1,), (1,)), ((), ()))

    def kernel(*refs):
        # Argument order:
        #   x (bt, in) bf16,
        #   w_lin8 (8, in) f32  [row 0 = wide weights, rows 1..7 zero],
        #   (W_l (in, out) bf16, scale_l (1, out) f32, bias_l (1, out) f32) * n_layers,
        #   w_out8 (8, last) f32 [row 0 = output head, rows 1..7 zero],
        #   bias (1, 1) f32 in SMEM  [= b_lin + b_out],
        #   out (1, bt) f32
        x_ref = refs[0]
        wlin_ref = refs[1]
        layer_refs = [(refs[2 + 3 * l], refs[3 + 3 * l], refs[4 + 3 * l])
                      for l in range(n_layers)]
        wout_ref = refs[2 + 3 * n_layers]
        bias_ref = refs[3 + 3 * n_layers]
        out_ref = refs[4 + 3 * n_layers]

        x_bf = x_ref[...]                          # (bt, in) bf16 straight from the DMA
        x_f32 = x_bf.astype(jnp.float32)           # upcast only for the wide branch

        # Wide branch: f32 NT matmul -> (8, bt), lane-dense; only row 0 is meaningful.
        wide = jax.lax.dot_general(wlin_ref[...], x_f32, nt_dims,
                                   preferred_element_type=jnp.float32)

        # Deep MLP: bf16 MXU matmul with f32 accumulation, then f32 BN scale/bias + ReLU.
        h_bf = x_bf
        h_f32 = x_f32
        for l, (w_ref, s_ref, b_ref) in enumerate(layer_refs):
            z = jnp.dot(h_bf, w_ref[...], preferred_element_type=jnp.float32)
            z = z * s_ref[...] + b_ref[...]        # BatchNorm (running stats) in f32
            h_f32 = jnp.maximum(z, 0.0)            # ReLU (Dropout = identity in eval)
            if l + 1 < n_layers:
                h_bf = h_f32.astype(jnp.bfloat16)

        # Output head: f32 NT matmul -> (8, bt), lane-dense.
        deep = jax.lax.dot_general(wout_ref[...], h_f32, nt_dims,
                                   preferred_element_type=jnp.float32)

        logit = deep[0:1, :] + wide[0:1, :] + bias_ref[0, 0]
        out_ref[...] = jax.nn.sigmoid(logit).astype(out_ref.dtype)

    return kernel


def _prepare_kernel_params(params, eps):
    """Host-side layout plumbing: transpose weights, pad 1-wide heads to 8 rows,
    keep BN scale as f32 (applied post-matmul), fold BN shift into an f32 bias."""

    def pad8(row):  # (1, D) -> (8, D); rows 1..7 are zero
        return jnp.pad(row.astype(jnp.float32), ((0, 7), (0, 0)))

    vmem_params = [pad8(params["w_lin"])]                               # (8, in)
    for lp in params["layers"]:
        scale = (lp["gamma"] * jax.lax.rsqrt(lp["var"] + eps)).astype(jnp.float32)
        w_t = jnp.transpose(lp["w"]).astype(jnp.bfloat16)               # (in, out), unscaled
        b_fold = ((lp["b"] - lp["mean"]) * scale + lp["beta"]).astype(jnp.float32)
        vmem_params += [w_t, scale, b_fold]
    vmem_params.append(pad8(params["w_out"]))                           # (8, last)

    bias = (params["b_lin"] + params["b_out"]).astype(jnp.float32).reshape(1, 1)
    return vmem_params, bias


def widedeep_forward(x, params, *, batch_tile=1024, eps=1e-5,
                     vmem_limit_bytes=56 * 1024 * 1024,
                     single_buffer_weights=True, x_buffer_count=None):
    """Fused WideDeep forward pass; grid over batch tiles, weights resident in VMEM.

    Per-generation tuning: on v5e/v6e pass batch_tile in 1024-2048 and
    vmem_limit_bytes ~96-100 MiB; on v7x keep batch_tile modest and the limit <= ~56 MiB.
    Optionally set x_buffer_count=3 on v6e/v5e if the x DMA is exposed in a profile.
    """
    B, input_dim = x.shape
    n_layers = len(params["layers"])

    # --- batch tiling ---------------------------------------------------------
    if batch_tile > B:
        batch_tile = B
    assert B % batch_tile == 0, "batch must be divisible by batch_tile (no ragged tail)"
    # v7x megacore: keep the parallel grid even so both TensorCores get balanced work.
    if (B // batch_tile) % 2 == 1 and batch_tile % 256 == 0:
        batch_tile //= 2
    assert batch_tile == B or batch_tile % 128 == 0, \
        "batch_tile must be a multiple of 128 (lane-dense tiles) or equal to the batch"
    grid = (B // batch_tile,)

    vmem_params, bias = _prepare_kernel_params(params, eps)
    kernel = _make_widedeep_kernel(n_layers)

    # Feed the activation stream in bf16 (ideally the caller already provides bf16).
    x_bf = x if x.dtype == jnp.bfloat16 else x.astype(jnp.bfloat16)

    def build_specs(use_pipeline_modes):
        w_kwargs = {}
        x_kwargs = {}
        if use_pipeline_modes:
            if single_buffer_weights:
                # Constant-index blocks are fetched once; one buffer is enough
                # (halves the resident-weight VMEM footprint -- key on v7x).
                w_kwargs = dict(pipeline_mode=pl.Buffered(1))
            if x_buffer_count is not None:
                x_kwargs = dict(pipeline_mode=pl.Buffered(int(x_buffer_count)))
        in_specs = [pl.BlockSpec((batch_tile, input_dim), lambda i: (i, 0), **x_kwargs)]
        for p in vmem_params:
            in_specs.append(pl.BlockSpec(p.shape, lambda i: (0, 0), **w_kwargs))
        in_specs.append(pl.BlockSpec(memory_space=pltpu.MemorySpace.SMEM))  # scalar bias
        out_spec = pl.BlockSpec((1, batch_tile), lambda i: (0, i))          # lane-dense row
        return in_specs, out_spec

    def run(use_pipeline_modes):
        in_specs, out_spec = build_specs(use_pipeline_modes)
        return pl.pallas_call(
            kernel,
            out_shape=jax.ShapeDtypeStruct((1, B), jnp.float32),
            grid_spec=pltpu.PrefetchScalarGridSpec(
                num_scalar_prefetch=0,
                grid=grid,
                in_specs=in_specs,
                out_specs=out_spec,
            ),
            compiler_params=pltpu.CompilerParams(
                dimension_semantics=("parallel",),
                vmem_limit_bytes=int(vmem_limit_bytes) if vmem_limit_bytes else None,
            ),
        )(x_bf, *vmem_params, bias)

    want_pipeline_modes = single_buffer_weights or (x_buffer_count is not None)
    if want_pipeline_modes:
        try:
            out_row = run(True)
        except Exception:
            # pipeline_mode / Buffered(1) not supported by this build -> default buffering.
            out_row = run(False)
    else:
        out_row = run(False)

    return out_row.reshape(B, 1)


def init_widedeep_params(key, input_dim, layers_dim):
    """Deterministic parameter init matching the module's shapes (PyTorch layout)."""
    params = {}
    k = key

    def nrm(k, shape, scale):
        return jax.random.normal(k, shape, dtype=jnp.float32) * scale

    k, sub = jax.random.split(k)
    params["w_lin"] = nrm(sub, (1, input_dim), 0.1)           # Linear(input_dim, 1)
    k, sub = jax.random.split(k)
    params["b_lin"] = nrm(sub, (1, 1), 0.1)

    layers = []
    in_dim = input_dim
    for out_dim in layers_dim:
        k, sub = jax.random.split(k)
        w = nrm(sub, (out_dim, in_dim), 0.1)                  # Linear(in_dim, out_dim)
        k, sub = jax.random.split(k)
        b = nrm(sub, (1, out_dim), 0.1)
        layers.append({
            "w": w,
            "b": b,
            "gamma": jnp.ones((1, out_dim), jnp.float32),     # BatchNorm1d affine
            "beta": jnp.zeros((1, out_dim), jnp.float32),
            "mean": jnp.zeros((1, out_dim), jnp.float32),     # running stats
            "var": jnp.ones((1, out_dim), jnp.float32),
        })
        in_dim = out_dim
    params["layers"] = layers

    k, sub = jax.random.split(k)
    params["w_out"] = nrm(sub, (1, layers_dim[-1]), 0.1)      # Linear(layers_dim[-1], 1)
    k, sub = jax.random.split(k)
    params["b_out"] = nrm(sub, (1, 1), 0.1)
    return params


def widedeep_reference(x, params, eps=1e-5):
    """Pure-JAX f32 reference (unfolded BN, PyTorch semantics) for correctness checking."""
    wide = x @ params["w_lin"].T + params["b_lin"]
    h = x
    for lp in params["layers"]:
        z = h @ lp["w"].T + lp["b"]
        z = (z - lp["mean"]) * jax.lax.rsqrt(lp["var"] + eps) * lp["gamma"] + lp["beta"]
        h = jnp.maximum(z, 0.0)
    deep = h @ params["w_out"].T + params["b_out"]
    return jax.nn.sigmoid(deep + wide)


if __name__ == "__main__":
    # Deterministic example: batch=512, input_dim=128, layers_dim=(128, 128).
    # (Even grid of 2 batch tiles after auto-clamping -> exercises the megacore path.)
    key = jax.random.PRNGKey(0)
    k_x, k_p = jax.random.split(key)

    batch, input_dim = 512, 128
    layers_dim = (128, 128)

    x = jax.random.normal(k_x, (batch, input_dim), dtype=jnp.float32)
    params = init_widedeep_params(k_p, input_dim, layers_dim)

    out = widedeep_forward(x, params)
    out = jax.block_until_ready(out)

    ref = widedeep_reference(x, params)
    assert out.shape == (batch, 1)
    max_err = float(jnp.max(jnp.abs(out - ref)))
    # bf16 activations/weights with f32 accumulation -> small difference vs f32 reference.
    assert max_err < 2e-2, f"max abs err {max_err}"

    print("KERNEL_OK")
</pallas_src>

<mosaic_0001>
module attributes {stable_mosaic.version = 11 : i64} {
  func.func @kernel(%arg0: i32, %arg1: memref<256x128xbf16, #tpu.memory_space<vmem>>, %arg2: memref<8x128xf32, #tpu.memory_space<vmem>>, %arg3: memref<128x128xbf16, #tpu.memory_space<vmem>>, %arg4: memref<1x128xf32, #tpu.memory_space<vmem>>, %arg5: memref<1x128xf32, #tpu.memory_space<vmem>>, %arg6: memref<128x128xbf16, #tpu.memory_space<vmem>>, %arg7: memref<1x128xf32, #tpu.memory_space<vmem>>, %arg8: memref<1x128xf32, #tpu.memory_space<vmem>>, %arg9: memref<8x128xf32, #tpu.memory_space<vmem>>, %arg10: memref<1x1xf32, #tpu.memory_space<smem>>, %arg11: memref<1x256xf32, #tpu.memory_space<vmem>>) attributes {dimension_semantics = [#tpu.dimension_semantics<parallel>], iteration_bounds = array<i64: 2>, scalar_prefetch = 0 : i64, scratch_operands = 0 : i64, tpu.core_type = #tpu.core_type<tc>, window_params = [{transform_indices = @transform_0, window_bounds = array<i64: 256, 128>}, {pipeline_mode = #tpu.pipeline_mode<synchronous>, transform_indices = @transform_1, window_bounds = array<i64: 8, 128>}, {pipeline_mode = #tpu.pipeline_mode<synchronous>, transform_indices = @transform_2, window_bounds = array<i64: 128, 128>}, {pipeline_mode = #tpu.pipeline_mode<synchronous>, transform_indices = @transform_3, window_bounds = array<i64: 1, 128>}, {pipeline_mode = #tpu.pipeline_mode<synchronous>, transform_indices = @transform_4, window_bounds = array<i64: 1, 128>}, {pipeline_mode = #tpu.pipeline_mode<synchronous>, transform_indices = @transform_5, window_bounds = array<i64: 128, 128>}, {pipeline_mode = #tpu.pipeline_mode<synchronous>, transform_indices = @transform_6, window_bounds = array<i64: 1, 128>}, {pipeline_mode = #tpu.pipeline_mode<synchronous>, transform_indices = @transform_7, window_bounds = array<i64: 1, 128>}, {pipeline_mode = #tpu.pipeline_mode<synchronous>, transform_indices = @transform_8, window_bounds = array<i64: 8, 128>}, {transform_indices = @transform_9, window_bounds = array<i64: 1, 1>}, {transform_indices = @transform_10, window_bounds = array<i64: 1, 256>}]} {
    %c0 = arith.constant 0 : index
    %c0_0 = arith.constant 0 : index
    %0 = vector.load %arg1[%c0, %c0_0] : memref<256x128xbf16, #tpu.memory_space<vmem>>, vector<256x128xbf16>
    %1 = arith.extf %0 : vector<256x128xbf16> to vector<256x128xf32>
    %c0_1 = arith.constant 0 : index
    %c0_2 = arith.constant 0 : index
    %2 = vector.load %arg2[%c0_1, %c0_2] : memref<8x128xf32, #tpu.memory_space<vmem>>, vector<8x128xf32>
    %cst = arith.constant dense<0.000000e+00> : vector<8x256xf32>
    %3 = tpu.matmul %2, %1, %cst {dimension_numbers = #tpu.dot_dimension_numbers<[1], [1], [0], [0], [0, 0, 1, 0], [], []>} : vector<8x128xf32>, vector<256x128xf32>, vector<8x256xf32> -> vector<8x256xf32>
    %c0_3 = arith.constant 0 : index
    %c0_4 = arith.constant 0 : index
    %4 = vector.load %arg3[%c0_3, %c0_4] : memref<128x128xbf16, #tpu.memory_space<vmem>>, vector<128x128xbf16>
    %cst_5 = arith.constant dense<0.000000e+00> : vector<256x128xf32>
    %5 = tpu.matmul %0, %4, %cst_5 {dimension_numbers = #tpu.dot_dimension_numbers<[1], [0], [0], [1], [0, 0, 1, 1], [], []>} : vector<256x128xbf16>, vector<128x128xbf16>, vector<256x128xf32> -> vector<256x128xf32>
    %c0_6 = arith.constant 0 : index
    %c0_7 = arith.constant 0 : index
    %6 = vector.load %arg4[%c0_6, %c0_7] : memref<1x128xf32, #tpu.memory_space<vmem>>, vector<1x128xf32>
    %7 = vector.broadcast %6 : vector<1x128xf32> to vector<256x128xf32>
    %8 = arith.mulf %5, %7 : vector<256x128xf32>
    %c0_8 = arith.constant 0 : index
    %c0_9 = arith.constant 0 : index
    %9 = vector.load %arg5[%c0_8, %c0_9] : memref<1x128xf32, #tpu.memory_space<vmem>>, vector<1x128xf32>
    %10 = vector.broadcast %9 : vector<1x128xf32> to vector<256x128xf32>
    %11 = arith.addf %8, %10 : vector<256x128xf32>
    %cst_10 = arith.constant 0.000000e+00 : f32
    %12 = vector.broadcast %cst_10 : f32 to vector<256x128xf32>
    %13 = arith.maximumf %11, %12 : vector<256x128xf32>
    %14 = arith.truncf %13 : vector<256x128xf32> to vector<256x128xbf16>
    %c0_11 = arith.constant 0 : index
    %c0_12 = arith.constant 0 : index
    %15 = vector.load %arg6[%c0_11, %c0_12] : memref<128x128xbf16, #tpu.memory_space<vmem>>, vector<128x128xbf16>
    %cst_13 = arith.constant dense<0.000000e+00> : vector<256x128xf32>
    %16 = tpu.matmul %14, %15, %cst_13 {dimension_numbers = #tpu.dot_dimension_numbers<[1], [0], [0], [1], [0, 0, 1, 1], [], []>} : vector<256x128xbf16>, vector<128x128xbf16>, vector<256x128xf32> -> vector<256x128xf32>
    %c0_14 = arith.constant 0 : index
    %c0_15 = arith.constant 0 : index
    %17 = vector.load %arg7[%c0_14, %c0_15] : memref<1x128xf32, #tpu.memory_space<vmem>>, vector<1x128xf32>
    %18 = vector.broadcast %17 : vector<1x128xf32> to vector<256x128xf32>
    %19 = arith.mulf %16, %18 : vector<256x128xf32>
    %c0_16 = arith.constant 0 : index
    %c0_17 = arith.constant 0 : index
    %20 = vector.load %arg8[%c0_16, %c0_17] : memref<1x128xf32, #tpu.memory_space<vmem>>, vector<1x128xf32>
    %21 = vector.broadcast %20 : vector<1x128xf32> to vector<256x128xf32>
    %22 = arith.addf %19, %21 : vector<256x128xf32>
    %cst_18 = arith.constant 0.000000e+00 : f32
    %23 = vector.broadcast %cst_18 : f32 to vector<256x128xf32>
    %24 = arith.maximumf %22, %23 : vector<256x128xf32>
    %c0_19 = arith.constant 0 : index
    %c0_20 = arith.constant 0 : index
    %25 = vector.load %arg9[%c0_19, %c0_20] : memref<8x128xf32, #tpu.memory_space<vmem>>, vector<8x128xf32>
    %cst_21 = arith.constant dense<0.000000e+00> : vector<8x256xf32>
    %26 = tpu.matmul %25, %24, %cst_21 {dimension_numbers = #tpu.dot_dimension_numbers<[1], [1], [0], [0], [0, 0, 1, 0], [], []>} : vector<8x128xf32>, vector<256x128xf32>, vector<8x256xf32> -> vector<8x256xf32>
    %27 = vector.extract_strided_slice %26 {offsets = [0, 0], sizes = [1, 256], strides = [1, 1]} : vector<8x256xf32> to vector<1x256xf32>
    %28 = vector.extract_strided_slice %3 {offsets = [0, 0], sizes = [1, 256], strides = [1, 1]} : vector<8x256xf32> to vector<1x256xf32>
    %29 = arith.addf %27, %28 : vector<1x256xf32>
    %c0_22 = arith.constant 0 : index
    %c0_23 = arith.constant 0 : index
    %30 = memref.load %arg10[%c0_22, %c0_23] : memref<1x1xf32, #tpu.memory_space<smem>>
    %31 = vector.broadcast %30 : f32 to vector<1x256xf32>
    %32 = arith.addf %29, %31 : vector<1x256xf32>
    %33 = arith.negf %32 : vector<1x256xf32>
    %34 = math.exp %33 : vector<1x256xf32>
    %cst_24 = arith.constant 1.000000e+00 : f32
    %35 = vector.broadcast %cst_24 : f32 to vector<1x256xf32>
    %36 = arith.addf %35, %34 : vector<1x256xf32>
    %37 = arith.divf %35, %36 : vector<1x256xf32>
    %c0_25 = arith.constant 0 : index
    %c0_26 = arith.constant 0 : index
    %38 = vector.load %arg11[%c0_25, %c0_26] : memref<1x256xf32, #tpu.memory_space<vmem>>, vector<1x256xf32>
    tpu.vector_store %arg11[%c0_25, %c0_26], %37 {strides = array<i32>} : memref<1x256xf32, #tpu.memory_space<vmem>>, vector<1x256xf32>,
    return
  }
  func.func @transform_0(%arg0: i32) -> (i32, i32) {
    %c0_i32 = arith.constant 0 : i32
    %c0_i32_0 = arith.constant 0 : i32
    return %arg0, %c0_i32 : i32, i32
  }
  func.func @transform_1(%arg0: i32) -> (i32, i32) {
    %c0_i32 = arith.constant 0 : i32
    %c0_i32_0 = arith.constant 0 : i32
    %c0_i32_1 = arith.constant 0 : i32
    return %c0_i32, %c0_i32_0 : i32, i32
  }
  func.func @transform_2(%arg0: i32) -> (i32, i32) {
    %c0_i32 = arith.constant 0 : i32
    %c0_i32_0 = arith.constant 0 : i32
    %c0_i32_1 = arith.constant 0 : i32
    return %c0_i32, %c0_i32_0 : i32, i32
  }
  func.func @transform_3(%arg0: i32) -> (i32, i32) {
    %c0_i32 = arith.constant 0 : i32
    %c0_i32_0 = arith.constant 0 : i32
    %c0_i32_1 = arith.constant 0 : i32
    return %c0_i32, %c0_i32_0 : i32, i32
  }
  func.func @transform_4(%arg0: i32) -> (i32, i32) {
    %c0_i32 = arith.constant 0 : i32
    %c0_i32_0 = arith.constant 0 : i32
    %c0_i32_1 = arith.constant 0 : i32
    return %c0_i32, %c0_i32_0 : i32, i32
  }
  func.func @transform_5(%arg0: i32) -> (i32, i32) {
    %c0_i32 = arith.constant 0 : i32
    %c0_i32_0 = arith.constant 0 : i32
    %c0_i32_1 = arith.constant 0 : i32
    return %c0_i32, %c0_i32_0 : i32, i32
  }
  func.func @transform_6(%arg0: i32) -> (i32, i32) {
    %c0_i32 = arith.constant 0 : i32
    %c0_i32_0 = arith.constant 0 : i32
    %c0_i32_1 = arith.constant 0 : i32
    return %c0_i32, %c0_i32_0 : i32, i32
  }
  func.func @transform_7(%arg0: i32) -> (i32, i32) {
    %c0_i32 = arith.constant 0 : i32
    %c0_i32_0 = arith.constant 0 : i32
    %c0_i32_1 = arith.constant 0 : i32
    return %c0_i32, %c0_i32_0 : i32, i32
  }
  func.func @transform_8(%arg0: i32) -> (i32, i32) {
    %c0_i32 = arith.constant 0 : i32
    %c0_i32_0 = arith.constant 0 : i32
    %c0_i32_1 = arith.constant 0 : i32
    return %c0_i32, %c0_i32_0 : i32, i32
  }
  func.func @transform_9(%arg0: i32) -> (i32, i32) {
    %c0_i32 = arith.constant 0 : i32
    %c0_i32_0 = arith.constant 0 : i32
    %c0_i32_1 = arith.constant 0 : i32
    return %c0_i32, %c0_i32_0 : i32, i32
  }
  func.func @transform_10(%arg0: i32) -> (i32, i32) {
    %c0_i32 = arith.constant 0 : i32
    %c0_i32_0 = arith.constant 0 : i32
    return %c0_i32, %arg0 : i32, i32
  }
}

module attributes {stable_mosaic.version = 11 : i64} {
  func.func @kernel(%arg0: i32, %arg1: memref<256x128xbf16, #tpu.memory_space<vmem>>, %arg2: memref<8x128xf32, #tpu.memory_space<vmem>>, %arg3: memref<128x128xbf16, #tpu.memory_space<vmem>>, %arg4: memref<1x128xf32, #tpu.memory_space<vmem>>, %arg5: memref<1x128xf32, #tpu.memory_space<vmem>>, %arg6: memref<128x128xbf16, #tpu.memory_space<vmem>>, %arg7: memref<1x128xf32, #tpu.memory_space<vmem>>, %arg8: memref<1x128xf32, #tpu.memory_space<vmem>>, %arg9: memref<8x128xf32, #tpu.memory_space<vmem>>, %arg10: memref<1x1xf32, #tpu.memory_space<smem>>, %arg11: memref<1x256xf32, #tpu.memory_space<vmem>>) attributes {dimension_semantics = [#tpu.dimension_semantics<parallel>], iteration_bounds = array<i64: 2>, scalar_prefetch = 0 : i64, scratch_operands = 0 : i64, tpu.core_type = #tpu.core_type<tc>, window_params = [{transform_indices = @transform_0, window_bounds = array<i64: 256, 128>}, {pipeline_mode = #tpu.pipeline_mode<synchronous>, transform_indices = @transform_1, window_bounds = array<i64: 8, 128>}, {pipeline_mode = #tpu.pipeline_mode<synchronous>, transform_indices = @transform_2, window_bounds = array<i64: 128, 128>}, {pipeline_mode = #tpu.pipeline_mode<synchronous>, transform_indices = @transform_3, window_bounds = array<i64: 1, 128>}, {pipeline_mode = #tpu.pipeline_mode<synchronous>, transform_indices = @transform_4, window_bounds = array<i64: 1, 128>}, {pipeline_mode = #tpu.pipeline_mode<synchronous>, transform_indices = @transform_5, window_bounds = array<i64: 128, 128>}, {pipeline_mode = #tpu.pipeline_mode<synchronous>, transform_indices = @transform_6, window_bounds = array<i64: 1, 128>}, {pipeline_mode = #tpu.pipeline_mode<synchronous>, transform_indices = @transform_7, window_bounds = array<i64: 1, 128>}, {pipeline_mode = #tpu.pipeline_mode<synchronous>, transform_indices = @transform_8, window_bounds = array<i64: 8, 128>}, {transform_indices = @transform_9, window_bounds = array<i64: 1, 1>}, {transform_indices = @transform_10, window_bounds = array<i64: 1, 256>}]} {
    %c0 = arith.constant 0 : index
    %c0_0 = arith.constant 0 : index
    %0 = vector.load %arg1[%c0, %c0_0] : memref<256x128xbf16, #tpu.memory_space<vmem>>, vector<256x128xbf16>
    %1 = arith.extf %0 : vector<256x128xbf16> to vector<256x128xf32>
    %c0_1 = arith.constant 0 : index
    %c0_2 = arith.constant 0 : index
    %2 = vector.load %arg2[%c0_1, %c0_2] : memref<8x128xf32, #tpu.memory_space<vmem>>, vector<8x128xf32>
    %cst = arith.constant dense<0.000000e+00> : vector<8x256xf32>
    %3 = tpu.matmul %2, %1, %cst {dimension_numbers = #tpu.dot_dimension_numbers<[1], [1], [0], [0], [0, 0, 1, 0], [], []>} : vector<8x128xf32>, vector<256x128xf32>, vector<8x256xf32> -> vector<8x256xf32>
    %c0_3 = arith.constant 0 : index
    %c0_4 = arith.constant 0 : index
    %4 = vector.load %arg3[%c0_3, %c0_4] : memref<128x128xbf16, #tpu.memory_space<vmem>>, vector<128x128xbf16>
    %cst_5 = arith.constant dense<0.000000e+00> : vector<256x128xf32>
    %5 = tpu.matmul %0, %4, %cst_5 {dimension_numbers = #tpu.dot_dimension_numbers<[1], [0], [0], [1], [0, 0, 1, 1], [], []>} : vector<256x128xbf16>, vector<128x128xbf16>, vector<256x128xf32> -> vector<256x128xf32>
    %c0_6 = arith.constant 0 : index
    %c0_7 = arith.constant 0 : index
    %6 = vector.load %arg4[%c0_6, %c0_7] : memref<1x128xf32, #tpu.memory_space<vmem>>, vector<1x128xf32>
    %7 = vector.broadcast %6 : vector<1x128xf32> to vector<256x128xf32>
    %8 = arith.mulf %5, %7 : vector<256x128xf32>
    %c0_8 = arith.constant 0 : index
    %c0_9 = arith.constant 0 : index
    %9 = vector.load %arg5[%c0_8, %c0_9] : memref<1x128xf32, #tpu.memory_space<vmem>>, vector<1x128xf32>
    %10 = vector.broadcast %9 : vector<1x128xf32> to vector<256x128xf32>
    %11 = arith.addf %8, %10 : vector<256x128xf32>
    %cst_10 = arith.constant 0.000000e+00 : f32
    %12 = vector.broadcast %cst_10 : f32 to vector<256x128xf32>
    %13 = arith.maximumf %11, %12 : vector<256x128xf32>
    %14 = arith.truncf %13 : vector<256x128xf32> to vector<256x128xbf16>
    %c0_11 = arith.constant 0 : index
    %c0_12 = arith.constant 0 : index
    %15 = vector.load %arg6[%c0_11, %c0_12] : memref<128x128xbf16, #tpu.memory_space<vmem>>, vector<128x128xbf16>
    %cst_13 = arith.constant dense<0.000000e+00> : vector<256x128xf32>
    %16 = tpu.matmul %14, %15, %cst_13 {dimension_numbers = #tpu.dot_dimension_numbers<[1], [0], [0], [1], [0, 0, 1, 1], [], []>} : vector<256x128xbf16>, vector<128x128xbf16>, vector<256x128xf32> -> vector<256x128xf32>
    %c0_14 = arith.constant 0 : index
    %c0_15 = arith.constant 0 : index
    %17 = vector.load %arg7[%c0_14, %c0_15] : memref<1x128xf32, #tpu.memory_space<vmem>>, vector<1x128xf32>
    %18 = vector.broadcast %17 : vector<1x128xf32> to vector<256x128xf32>
    %19 = arith.mulf %16, %18 : vector<256x128xf32>
    %c0_16 = arith.constant 0 : index
    %c0_17 = arith.constant 0 : index
    %20 = vector.load %arg8[%c0_16, %c0_17] : memref<1x128xf32, #tpu.memory_space<vmem>>, vector<1x128xf32>
    %21 = vector.broadcast %20 : vector<1x128xf32> to vector<256x128xf32>
    %22 = arith.addf %19, %21 : vector<256x128xf32>
    %cst_18 = arith.constant 0.000000e+00 : f32
    %23 = vector.broadcast %cst_18 : f32 to vector<256x128xf32>
    %24 = arith.maximumf %22, %23 : vector<256x128xf32>
    %c0_19 = arith.constant 0 : index
    %c0_20 = arith.constant 0 : index
    %25 = vector.load %arg9[%c0_19, %c0_20] : memref<8x128xf32, #tpu.memory_space<vmem>>, vector<8x128xf32>
    %cst_21 = arith.constant dense<0.000000e+00> : vector<8x256xf32>
    %26 = tpu.matmul %25, %24, %cst_21 {dimension_numbers = #tpu.dot_dimension_numbers<[1], [1], [0], [0], [0, 0, 1, 0], [], []>} : vector<8x128xf32>, vector<256x128xf32>, vector<8x256xf32> -> vector<8x256xf32>
    %27 = vector.extract_strided_slice %26 {offsets = [0, 0], sizes = [1, 256], strides = [1, 1]} : vector<8x256xf32> to vector<1x256xf32>
    %28 = vector.extract_strided_slice %3 {offsets = [0, 0], sizes = [1, 256], strides = [1, 1]} : vector<8x256xf32> to vector<1x256xf32>
    %29 = arith.addf %27, %28 : vector<1x256xf32>
    %c0_22 = arith.constant 0 : index
    %c0_23 = arith.constant 0 : index
    %30 = memref.load %arg10[%c0_22, %c0_23] : memref<1x1xf32, #tpu.memory_space<smem>>
    %31 = vector.broadcast %30 : f32 to vector<1x256xf32>
    %32 = arith.addf %29, %31 : vector<1x256xf32>
    %33 = arith.negf %32 : vector<1x256xf32>
    %34 = math.exp %33 : vector<1x256xf32>
    %cst_24 = arith.constant 1.000000e+00 : f32
    %35 = vector.broadcast %cst_24 : f32 to vector<1x256xf32>
    %36 = arith.addf %35, %34 : vector<1x256xf32>
    %37 = arith.divf %35, %36 : vector<1x256xf32>
    %c0_25 = arith.constant 0 : index
    %c0_26 = arith.constant 0 : index
    %38 = vector.load %arg11[%c0_25, %c0_26] : memref<1x256xf32, #tpu.memory_space<vmem>>, vector<1x256xf32>
    tpu.vector_store %arg11[%c0_25, %c0_26], %37 {strides = array<i32>} : memref<1x256xf32, #tpu.memory_space<vmem>>, vector<1x256xf32>,
    return
  }
  func.func @transform_0(%arg0: i32) -> (i32, i32) {
    %c0_i32 = arith.constant 0 : i32
    %c0_i32_0 = arith.constant 0 : i32
    return %arg0, %c0_i32 : i32, i32
  }
  func.func @transform_1(%arg0: i32) -> (i32, i32) {
    %c0_i32 = arith.constant 0 : i32
    %c0_i32_0 = arith.constant 0 : i32
    %c0_i32_1 = arith.constant 0 : i32
    return %c0_i32, %c0_i32_0 : i32, i32
  }
  func.func @transform_2(%arg0: i32) -> (i32, i32) {
    %c0_i32 = arith.constant 0 : i32
    %c0_i32_0 = arith.constant 0 : i32
    %c0_i32_1 = arith.constant 0 : i32
    return %c0_i32, %c0_i32_0 : i32, i32
  }
  func.func @transform_3(%arg0: i32) -> (i32, i32) {
    %c0_i32 = arith.constant 0 : i32
    %c0_i32_0 = arith.constant 0 : i32
    %c0_i32_1 = arith.constant 0 : i32
    return %c0_i32, %c0_i32_0 : i32, i32
  }
  func.func @transform_4(%arg0: i32) -> (i32, i32) {
    %c0_i32 = arith.constant 0 : i32
    %c0_i32_0 = arith.constant 0 : i32
    %c0_i32_1 = arith.constant 0 : i32
    return %c0_i32, %c0_i32_0 : i32, i32
  }
  func.func @transform_5(%arg0: i32) -> (i32, i32) {
    %c0_i32 = arith.constant 0 : i32
    %c0_i32_0 = arith.constant 0 : i32
    %c0_i32_1 = arith.constant 0 : i32
    return %c0_i32, %c0_i32_0 : i32, i32
  }
  func.func @transform_6(%arg0: i32) -> (i32, i32) {
    %c0_i32 = arith.constant 0 : i32
    %c0_i32_0 = arith.constant 0 : i32
    %c0_i32_1 = arith.constant 0 : i32
    return %c0_i32, %c0_i32_0 : i32, i32
  }
  func.func @transform_7(%arg0: i32) -> (i32, i32) {
    %c0_i32 = arith.constant 0 : i32
    %c0_i32_0 = arith.constant 0 : i32
    %c0_i32_1 = arith.constant 0 : i32
    return %c0_i32, %c0_i32_0 : i32, i32
  }
  func.func @transform_8(%arg0: i32) -> (i32, i32) {
    %c0_i32 = arith.constant 0 : i32
    %c0_i32_0 = arith.constant 0 : i32
    %c0_i32_1 = arith.constant 0 : i32
    return %c0_i32, %c0_i32_0 : i32, i32
  }
  func.func @transform_9(%arg0: i32) -> (i32, i32) {
    %c0_i32 = arith.constant 0 : i32
    %c0_i32_0 = arith.constant 0 : i32
    %c0_i32_1 = arith.constant 0 : i32
    return %c0_i32, %c0_i32_0 : i32, i32
  }
  func.func @transform_10(%arg0: i32) -> (i32, i32) {
    %c0_i32 = arith.constant 0 : i32
    %c0_i32_0 = arith.constant 0 : i32
    return %c0_i32, %arg0 : i32, i32
  }
}

</mosaic_0001>

<bundles_post_ra>
// kernel: tpu_custom_call.1
= control target key start
LH: loop header
LB: loop body
LE: loop exit
PB: predicated region body
PF: predicated region fallthrough
CT: control target
= control target key end

     0   :  { %s2578_s0 = inlined_call_operand.hbm [shape: bf16[512,128], index: 0, kind: input, shape index: {}]   ;;  %s2579_s1 = inlined_call_operand.hbm [shape: f32[8,128], index: 1, kind: input, shape index: {}]   ;;  %s2580_s2 = inlined_call_operand.hbm [shape: bf16[128,128], index: 2, kind: input, shape index: {}]   ;;  %s2581_s3 = inlined_call_operand.vmem [shape: f32[1,128], index: 3, kind: input, shape index: {}]   ;;  %s2582_s4 = inlined_call_operand.hbm [shape: f32[1,128], index: 4, kind: input, shape index: {}]   ;;  %s2583_s5 = inlined_call_operand.hbm [shape: bf16[128,128], index: 5, kind: input, shape index: {}]   ;;  %s2584_s6 = inlined_call_operand.hbm [shape: f32[1,128], index: 6, kind: input, shape index: {}]   ;;  %s2585_s7 = inlined_call_operand.hbm [shape: f32[1,128], index: 7, kind: input, shape index: {}]   ;;  %s2586_s8 = inlined_call_operand.vmem [shape: f32[8,128], index: 8, kind: input, shape index: {}]   ;;  %s2587_s9 = inlined_call_operand.<no memory space> [shape: f32[1,1], index: 9, kind: input, shape index: {}]   ;;  %s2588_s10 = inlined_call_operand.hbm [shape: f32[1,512], index: 10, kind: output, shape index: {}]  }
   0x1   :  { %2591 = sst [smem:[#allocation21_spill]] %s2579_s1 }
   0x2   :  { %2592 = sst [smem:[#allocation22_spill]] %s2580_s2 }
   0x3   :  { %2593 = sst [smem:[#allocation23_spill]] %s2582_s4 }
   0x4   :  { %2594 = sst [smem:[#allocation24_spill]] %s2583_s5 }
   0x5   :  { %15 = sst [smem:[#allocation2]] %s2587_s9 }
   0x6   :  { %16 = vsyncpa [#allocation4], 0 }
   0x7   :  { %18 = vsyncpa [#allocation4 + $0x1], 0 }
   0x8   :  { %19 = vsyncpa [#allocation7], 0 }
   0x9   :  { %20 = vsyncpa [#allocation10], 0 }
   0xa   :  { %21 = vsyncpa [#allocation13], 0 }
   0xb   :  { %22 = vsyncpa [#allocation5], 0 }
   0xc   :  { %24 = vsyncpa [#allocation5 + $0x1], 0  ;;  %s2125_s15 = smov 0   ;;  %s2127_s16 = smov 0  }
   0xd   :  { %s2129_s17 = smov 0   ;;  %s2131_s18 = smov 0  }
   0xe LB: > { %s2595_s1 = sld [smem:[#allocation21_spill]]  ;;  %s2149_s21 = sadd.s32 4294967295, %s2057_s18   ;;  %s2057_s18 = sphi %s2131_s18, %s2614_s18   ;;  %s2053_s17 = sphi %s2129_s17, %s2613_s17   ;;  %s2049_s16 = sphi %s2127_s16, %s2612_s16   ;;  %s2045_s15 = sphi %s2125_s15, %s2611_s15  }
   0xf   : > { %p1445_p0 = scmp.ge.s32.totalorder %s2057_s18, 1  ;;  %p51_p1 = scmp.eq.s32.totalorder %s2149_s21, 0 }
  0x10   : > { %p276_p2 = scmp.lt.s32.totalorder %s2057_s18, 3  ;;  %s2059_s23 = smov [#allocation6]  }
  0x11   : > { %s290_s24 = sshll.u32 %s2059_s23, 4  ;;  %s2597_s4 = sld [smem:[#allocation23_spill]]  ;;  %s291_s24 = int_to_ptr.vmem [resolvable:$true] %s290_s24 }
  0x12   : > { %p2154_p3 = pnand %p1445_p0, %p276_p2  ;;  %s2060_s29 = smov [#allocation9]  }
  0x13   : > { %s319_s30 = sshll.u32 %s2060_s29, 4  ;;  %s343_s13 = sshll.u32 %s2584_s6, 4  ;;  %s320_s30 = int_to_ptr.vmem [resolvable:$true] %s319_s30  ;;  %s344_s13 = int_to_ptr.hbm [resolvable:$true] %s343_s13 }
  0x14   : > { %s288_s20 = sshll.u32 %s2595_s1, 4  ;;  %p1676_p5 = pneg %p2154_p3  ;;  %s289_s20 = int_to_ptr.hbm [resolvable:$true] %s288_s20 }
  0x15   : > { %s2599_s2 = sld [smem:[#allocation22_spill]]  ;;  %s2061_s23 = smov [#allocation12]  }
  0x16   : > { %p2166_p6 = pnand %p1676_p5, %p51_p1  ;;  %s345_s25 = sshll.u32 %s2061_s23, 4  ;;  %s346_s25 = int_to_ptr.vmem [resolvable:$true] %s345_s25 }
  0x17   : > { %s317_s27 = sshll.u32 %s2597_s4, 4  ;;  %s2062_s26 = smov [#allocation8]   ;;  %s318_s27 = int_to_ptr.hbm [resolvable:$true] %s317_s27 }
  0x18   : > { %1679 = dma.hbm_to_vmem [thread:$0]  (!%p2166_p6), %s289_s20, 128, %s291_s24, [#allocation7]  }
  0x19   : > { %1685 = dma.hbm_to_vmem [thread:$0]  (!%p2166_p6), %s318_s27, 16, %s320_s30, [#allocation10]  }
  0x1a   : > { %1691 = dma.hbm_to_vmem [thread:$0]  (!%p2166_p6), %s344_s13, 16, %s346_s25, [#allocation13]  }
  0x1b   : > { %s299_s19 = sshll.u32 %s2599_s2, 4  ;;  %s301_s29 = sshll.u32 %s2062_s26, 4  ;;  %s300_s19 = int_to_ptr.hbm [resolvable:$true] %s299_s19  ;;  %s302_s29 = int_to_ptr.vmem [resolvable:$true] %s301_s29 }
  0x1c   : > { %s2589_s11 = smov 64   ;;  %s2590_s20 = smov 4  }
  0x1d   : > { %1682 = dma.hbm_to_vmem [thread:$0]  (!%p2166_p6), %s300_s19, 1024, %s302_s29, [#allocation7], %s2589_s11, %s2589_s11, %s2590_s20  }
  0x1e   : > { %s2600_s5 = sld [smem:[#allocation24_spill]]  ;;  %s2065_s12 = smov [#allocation11]  }
  0x1f   : > { %s330_s13 = sshll.u32 %s2065_s12, 4  ;;  %s355_s23 = sshll.u32 %s2585_s7, 4  ;;  %s331_s13 = int_to_ptr.vmem [resolvable:$true] %s330_s13  ;;  %s356_s23 = int_to_ptr.hbm [resolvable:$true] %s355_s23 }
  0x20   : > { %s2066_s19 = smov [#allocation14]   ;;  %s1444_s26 = sadd.s32 4294967294, %s2057_s18  }
  0x21   : > { %s357_s25 = sshll.u32 %s2066_s19, 4  ;;  %s2202_s29 = sadd.s32 1, %s2057_s18   ;;  %s358_s25 = int_to_ptr.vmem [resolvable:$true] %s357_s25 }
  0x22   : > { %1694 = dma.hbm_to_vmem [thread:$0]  (!%p2166_p6), %s356_s23, 16, %s358_s25, [#allocation13]  }
  0x23   : > { %s34_s24 = ssub.s32 %s2057_s18, %s2202_s29  ;;  %s37_s27 = sadd.s32 1, %s2053_s17 }
  0x24   : > { %s328_s30 = sshll.u32 %s2600_s5, 4  ;;  %p35_p7 = scmp.eq.s32.totalorder %s34_s24, 0  ;;  %s329_s30 = int_to_ptr.hbm [resolvable:$true] %s328_s30 }
  0x25   : > { %1688 = dma.hbm_to_vmem [thread:$0]  (!%p2166_p6), %s329_s30, 1024, %s331_s13, [#allocation10], %s2589_s11, %s2589_s11, %s2590_s20  }
  0x26   : > { %p44_p8 = scmp.ne.s32.totalorder %s2053_s17, %s2049_s16  ;;  %p45_p9 = scmp.eq.s32.totalorder %s2057_s18, 0 }
  0x27   : > { %p50_p10 = scmp.ne.s32.totalorder %s2049_s16, %s2045_s15  ;;  %p263_p13 = scmp.eq.s32.totalorder %s2149_s21, 1 }
  0x28   : > { %s2213_s30 = scalar_select %p35_p7, %s2053_s17, %s37_s27  }
  0x29   : > { %p2215_p11 = por %p45_p9, %p44_p8  ;;  %p2221_p12 = por %p51_p1, %p50_p10 }
  0x2a   : > { %p269_p0 = scmp.eq.s32.totalorder %s1444_s26, 1  ;;  %p1709_p2 = scmp.lt.s32.totalorder %s2057_s18, 2 }
  0x2b   : > { %s374_s13 = sand.u32 1, %s2053_s17   ;;  %p2228_p5 = por %p263_p13, %p44_p8 }
  0x2c   : > { %p2232_p6 = por %p269_p0, %p50_p10  ;;  %s1453_s23 = sshll.u32 %s374_s13, 7 }
  0x2d   : > { %s1599_s19 = sshll.u32 %s2057_s18, 7  ;;  %s378_s11 = scalar_lea.vmem [#allocation3], %s1453_s23 }
  0x2e   : > { %s383_s27 = scalar_lea.hbm %s2578_s0, %s1599_s19  ;;  %s386_s20 = sshll.u32 %s378_s11, 4  ;;  %s387_s20 = int_to_ptr.vmem [resolvable:$true] %s386_s20 }
  0x2f   : > { %s384_s1 = sshll.u32 %s383_s27, 4  ;;  %p2242_p7 = pnand %p1709_p2, %p2215_p11  ;;  %s385_s1 = int_to_ptr.hbm [resolvable:$true] %s384_s1 }
  0x30   : > { %s375_s2 = scalar_lea.sflag [#allocation4], %s374_s13  ;;  %s1949_s4 = sshra.s32 %s385_s1, 4  ;;  %s1950_s4 = int_to_ptr.hbm [resolvable:$true] %s1949_s4 }
  0x31   : > { %s1951_s5 = scalar_lea.hbm %s1950_s4, 128  ;;  %p1953_p9 = pneg %p2242_p7 }
  0x32   : > { %p1952_p8 = scmp.ne.s32.totalorder %s1950_s4, %s1951_s5  ;;  %s1956_s19 = scalar_lea.hbm %s2578_s0, 256 }
  0x33   : > { %p1957_p11 = scmp.lt.s32.totalorder %s1950_s4, %s2578_s0  ;;  %p1958_p0 = scmp.lt.s32.totalorder %s1956_s19, %s1951_s5 }
  0x34   : > { %p1954_p10 = pnand %p1953_p9, %p1952_p8 }
  0x35   : > { %p1959_p2 = por %p1958_p0, %p1957_p11 }
  0x36   : > { %p1955_p13 = pneg %p1954_p10 }
  0x38   : > { %p1960_p4 = pnand %p1959_p2, %p1955_p13 }
  0x3a   : > { %1963 = shalt.err (!%p1960_p4)
}
  0x3b   : > { %s2606_s13 = smov 4   ;;  %s2607_s24 = smov 64  }
  0x3c   : > { %1698 = dma.hbm_to_vmem [thread:$0]  (!%p2242_p7), %s385_s1, 2048, %s387_s20, %s375_s2, %s2607_s24, %s2607_s24, %s2606_s13  }
  0x3d   : > { %398 = sbr.rel (%p2154_p3) target bundleno = 787 (0x313), region = 60  ;;  %s2262_s27 = sand.u32 (!%p2154_p3), 1, %s2049_s16  }
  0x3e   : > { %s1457_s4 = sshll.u32 (!%p2154_p3), %s2262_s27, 7  ;;  %s401_s5 = scalar_lea.sflag (!%p2154_p3), [#allocation4], %s2262_s27 }
  0x3f   : > { %s2266_s23 = scalar_lea.vmem (!%p2154_p3), [#allocation3], %s1457_s4 }
  0x42   : > { %2024 = dma.done.wait (%p2221_p12), %s401_s5, 2048  }
  0x43   : > { %2026 = vsyncadd (%p2221_p12), %s401_s5, 4294965248 }
  0x44   : > { %2028 = dma.done.wait (%p51_p1), [#allocation7], 1152  }
  0x45   : > { %2030 = vsyncadd (%p51_p1), [#allocation7], 4294966144 }
  0x46   : > { %2032 = dma.done.wait (%p51_p1), [#allocation10], 1040  }
  0x47   : > { %2034 = vsyncadd (%p51_p1), [#allocation10], 4294966256 }
  0x48   : > { %2036 = dma.done.wait (%p51_p1), [#allocation13], 32  }
  0x49   : > { %2038 = vsyncadd (%p51_p1), [#allocation13], 4294967264  ;;  %v2285_v0 = vld [vmem:[%s2266_s23 + $0x3c] sm:$0xff]   ;;  %v488_v2 = vld [vmem:[%s2266_s23 + $0x34] sm:$0xff]   ;;  %s1248_s28 = sld [smem:[#allocation2]]  ;;  %s1464_s26 = sshll.u32 %s2262_s27, 1 }
  0x4a   : > { %v1623_v1 = vld [vmem:[#allocation8 + $0x38] sm:$0xff]  ;;  %v521_v3 = vunpack.c.l.bf16 %v2285_v0  ;;  %v1622_v4 = vld [vmem:[#allocation8 + $0x30] sm:$0xff]  ;;  %v520_v5 = vunpack.c.h.bf16 %v488_v2  ;;  %v1621_v6 = vld [vmem:[#allocation8 + $0x28] sm:$0xff]  ;;  %v519_v7 = vunpack.c.l.bf16 %v488_v2  ;;  %s1596_s11 = sshll.u32 %s2149_s21, 1  ;;  %s471_s21 = scalar_lea.vmem [#allocation15], %s1464_s26  ;;  %vm1293_vm7 = vcmask 1040384  }
  0x4b   : > { %1632 = vmatpush.bf16.msra.mxu2 %v1623_v1  ;;  %v486_v8 = vld [vmem:[%s2266_s23 + $0x2c] sm:$0xff]   ;;  %v1619_v11 = vld [vmem:[#allocation8 + $0x18] sm:$0xff]  ;;  %v1618_v14 = vld [vmem:[#allocation8 + $0x10] sm:$0xff]  ;;  %s1312_s12 = scalar_lea.hbm %s2588_s10, %s1596_s11  ;;  %s1314_s13 = sshll.u32 %s471_s21, 4  ;;  %s1315_s13 = int_to_ptr.vmem [resolvable:$true] %s1314_s13 }
  0x4c   : > { %539 = vmatpush.xpose.msra.mxu0 %v521_v3  ;;  %v1620_v9 = vld [vmem:[#allocation8 + $0x20] sm:$0xff]  ;;  %v518_v10 = vunpack.c.h.bf16 %v486_v8  ;;  %v517_v12 = vunpack.c.l.bf16 %v486_v8  ;;  %v1617_v16 = vld [vmem:[#allocation8 + $0x8] sm:$0xff]  ;;  %v482_v18 = vld [vmem:[%s2266_s23 + $0x1c] sm:$0xff]   ;;  %s1316_s24 = sshll.u32 %s1312_s12, 4  ;;  %s1302_s4 = scalar_lea.sflag [#allocation5], %s2262_s27  ;;  %s1317_s24 = int_to_ptr.hbm [resolvable:$true] %s1316_s24 }
  0x4d   : > { %v484_v13 = vld [vmem:[%s2266_s23 + $0x24] sm:$0xff]   ;;  %v514_v20 = vunpack.c.h.bf16 %v482_v18  ;;  %v513_v22 = vunpack.c.l.bf16 %v482_v18  ;;  %v480_v23 = vld [vmem:[%s2266_s23 + $0x14] sm:$0xff]   ;;  %v478_v26 = vld [vmem:[%s2266_s23 + $0xc] sm:$0xff]   ;;  %s1993_s5 = sshra.s32 %s1317_s24, 4  ;;  %s1999_s22 = scalar_lea.hbm %s2588_s10, 4  ;;  %s1994_s5 = int_to_ptr.hbm [resolvable:$true] %s1993_s5 }
  0x4e   : > { %v516_v15 = vunpack.c.h.bf16 %v484_v13  ;;  %v515_v17 = vunpack.c.l.bf16 %v484_v13  ;;  %v1616_v19 = vld [vmem:[#allocation8] sm:$0xff]  ;;  %v512_v24 = vunpack.c.h.bf16 %v480_v23  ;;  %v511_v25 = vunpack.c.l.bf16 %v480_v23  ;;  %v1606_v28 = vld [vmem:[%s2266_s23 + $0x30] sm:$0xff]  ;;  %v474_v33 = vld [vmem:[%s2266_s23] sm:$0xf]  ;;  %p2000_p12 = scmp.lt.s32.totalorder %s1994_s5, %s2588_s10 }
  0x4f   : > { %1633 = vmatpush.bf16.msra.mxu2 %v1622_v4  ;;  %v1605_v21 = vld [vmem:[%s2266_s23 + $0x28] sm:$0xff]  ;;  %v510_v27 = vunpack.c.h.bf16 %v478_v26  ;;  %v509_v29 = vunpack.c.l.bf16 %v478_v26  ;;  %v506_v34 = vunpack.c.l.bf16 %v474_v33  ;;  %v1607_v35 = vld [vmem:[%s2266_s23 + $0x38] sm:$0xff]  ;;  %v2299_v36 = vld [vmem:[#allocation6] sm:$0xff] }
  0x50   : > { %540 = vmatpush.xpose.msra.mxu0 %v520_v5  ;;  %v476_v30 = vld [vmem:[%s2266_s23 + $0x4] sm:$0xff]   ;;  %v1610_v41 = vld [vmem:[%s2266_s23 + $0x50] sm:$0xff]  ;;  %v505_v42 = vld [vmem:[%s2266_s23 + $0x78] sm:$0xff]  }
  0x51   : > { %v508_v31 = vunpack.c.h.bf16 %v476_v30  ;;  %v507_v32 = vunpack.c.l.bf16 %v476_v30  ;;  %v1608_v37 = vld [vmem:[%s2266_s23 + $0x40] sm:$0xff]  ;;  %v1609_v39 = vld [vmem:[%s2266_s23 + $0x48] sm:$0xff]  ;;  %v537_v43 = vunpack.c.h.bf16 %v505_v42  ;;  %v536_v44 = vunpack.c.l.bf16 %v505_v42  ;;  %v503_v46 = vld [vmem:[%s2266_s23 + $0x70] sm:$0xff]  }
  0x52   : > { %v1600_v38 = vld [vmem:[%s2266_s23] sm:$0xff]  ;;  %v1601_v40 = vld [vmem:[%s2266_s23 + $0x8] sm:$0xff]  ;;  %v535_v48 = vunpack.c.h.bf16 %v503_v46  ;;  %v534_v49 = vunpack.c.l.bf16 %v503_v46  ;;  %v1602_v50 = vld [vmem:[%s2266_s23 + $0x10] sm:$0xff] }
  0x53   : > { %1634 = vmatpush.bf16.msra.mxu2 %v1621_v6  ;;  %559 = vmatpush.xpose.msra.mxu1 %v537_v43  ;;  %v2308_v45 = vld [vmem:[#allocation11 + $0x38] sm:$0xff]  ;;  %v2312_v47 = vld [vmem:[#allocation11 + $0x30] sm:$0xff]  ;;  %v2316_v51 = vld [vmem:[#allocation11 + $0x28] sm:$0xff] }
  0x54   : > { %541 = vmatpush.xpose.msra.mxu0 %v519_v7  ;;  %1640 = vmatpush.bf16.msra.mxu3 %v2308_v45  ;;  %v1611_v52 = vld [vmem:[%s2266_s23 + $0x58] sm:$0xff]  ;;  %v501_v53 = vld [vmem:[%s2266_s23 + $0x68] sm:$0xff]   ;;  %v499_v58 = vld [vmem:[%s2266_s23 + $0x60] sm:$0xff]  }
  0x55   : > { %v533_v54 = vunpack.c.h.bf16 %v501_v53  ;;  %v2321_v55 = vld [vmem:[#allocation11 + $0x20] sm:$0xff]  ;;  %v532_v56 = vunpack.c.l.bf16 %v501_v53  ;;  %v2324_v57 = vld [vmem:[#allocation11 + $0x18] sm:$0xff]  ;;  %v531_v59 = vunpack.c.h.bf16 %v499_v58  ;;  %v2328_v60 = vld [vmem:[#allocation11 + $0x10] sm:$0xff]  ;;  %v530_v61 = vunpack.c.l.bf16 %v499_v58 }
  0x56   : > { %v1603_v62 = vld [vmem:[%s2266_s23 + $0x18] sm:$0xff] }
  0x57   : > { %1635 = vmatpush.bf16.msra.mxu2 %v1620_v9  ;;  %560 = vmatpush.xpose.msra.mxu1 %v536_v44  ;;  %v2332_v63 = vld [vmem:[#allocation11 + $0x8] sm:$0xff] }
  0x58   : > { %542 = vmatpush.xpose.msra.mxu0 %v518_v10  ;;  %1641 = vmatpush.bf16.msra.mxu3 %v2312_v47  ;;  %v497_v2 = vld [vmem:[%s2266_s23 + $0x58] sm:$0xff]   ;;  %v1613_v10 = vld [vmem:[%s2266_s23 + $0x68] sm:$0xff] }
  0x59   : > { %v529_v3 = vunpack.c.h.bf16 %v497_v2  ;;  %v528_v5 = vunpack.c.l.bf16 %v497_v2  ;;  %v1615_v33 = vld [vmem:[%s2266_s23 + $0x78] sm:$0xff] }
  0x5b   : > { %1636 = vmatpush.bf16.msra.mxu2 %v1619_v11  ;;  %561 = vmatpush.xpose.msra.mxu1 %v535_v48 }
  0x5c   : > { %543 = vmatpush.xpose.msra.mxu0 %v517_v12  ;;  %1642 = vmatpush.bf16.msra.mxu3 %v2316_v51 }
  0x5f   : > { %1637 = vmatpush.bf16.msra.mxu2 %v1618_v14  ;;  %562 = vmatpush.xpose.msra.mxu1 %v534_v49 }
  0x60   : > { %544 = vmatpush.xpose.msra.mxu0 %v516_v15  ;;  %1643 = vmatpush.bf16.msra.mxu3 %v2321_v55  ;;  %v2344_v15 = vld [vmem:[%s2581_s3] ss:$0 sm:$0xff] }
  0x63   : > { %1638 = vmatpush.bf16.msra.mxu2 %v1617_v16  ;;  %563 = vmatpush.xpose.msra.mxu1 %v533_v54 }
  0x64   : > { %545 = vmatpush.xpose.msra.mxu0 %v515_v17  ;;  %1644 = vmatpush.bf16.msra.mxu3 %v2324_v57 }
  0x67   : > { %1639 = vmatpush.bf16.msra.mxu2 %v1616_v19  ;;  %564 = vmatpush.xpose.msra.mxu1 %v532_v56 }
  0x68   : > { %546 = vmatpush.xpose.msra.mxu0 %v514_v20  ;;  %1645 = vmatpush.bf16.msra.mxu3 %v2328_v60  ;;  %v522_v20 = vunpack.c.h.bf16 %v2285_v0 }
  0x6a   : > { %772 = vmatmul.bf16.vlgmr.msra.gmra.mxu2 %v1605_v21 }
  0x6b   : > { %565 = vmatpush.xpose.msra.mxu1 %v531_v59 }
  0x6c   : > { %547 = vmatpush.xpose.msra.mxu0 %v513_v22  ;;  %1646 = vmatpush.bf16.msra.mxu3 %v2332_v63 }
  0x6f   : > { %566 = vmatpush.xpose.msra.mxu1 %v530_v61 }
  0x70   : > { %548 = vmatpush.xpose.msra.mxu0 %v512_v24  ;;  %v1614_v24 = vld [vmem:[%s2266_s23 + $0x70] sm:$0xff] }
  0x73   : > { %567 = vmatpush.xpose.msra.mxu1 %v529_v3 }
  0x74   : > { %549 = vmatpush.xpose.msra.mxu0 %v511_v25 }
  0x77   : > { %568 = vmatpush.xpose.msra.mxu1 %v528_v5 }
  0x78   : > { %550 = vmatpush.xpose.msra.mxu0 %v510_v27 }
  0x7a   : > { %777 = vmatmul.bf16.gmra.mxu2 %v1606_v28 }
  0x7c   : > { %551 = vmatpush.xpose.msra.mxu0 %v509_v29 }
  0x80   : > { %552 = vmatpush.xpose.msra.mxu0 %v508_v31 }
  0x84   : > { %553 = vmatpush.xpose.msra.mxu0 %v507_v32 }
  0x88   : > { %554 = vmatpush.xpose.msra.mxu0 %v506_v34 }
  0x8a   : > { %782 = vmatmul.bf16.gmra.mxu2 %v1607_v35 }
  0x8b   : > { %555 = vmatmul.f32.vlgmr.msra.gmra.mxu0 %v2299_v36 }
  0x8c   : > { %739 = vmatpush.bf16.msrb.mxu0 %v1623_v1  ;;  %v1612_v1 = vld [vmem:[%s2266_s23 + $0x60] sm:$0xff] }
  0x90   : > { %740 = vmatpush.bf16.msrb.mxu0 %v1622_v4  ;;  %v1624_v4 = vld [vmem:[#allocation11] sm:$0xff] }
  0x91   : > { %1647 = vmatpush.bf16.msra.mxu3 %v1624_v4 }
  0x94   : > { %741 = vmatpush.bf16.msrb.mxu0 %v1621_v6  ;;  %v495_v6 = vld [vmem:[%s2266_s23 + $0x50] sm:$0xff]  }
  0x95   : > { %v527_v7 = vunpack.c.h.bf16 %v495_v6  ;;  %v526_v8 = vunpack.c.l.bf16 %v495_v6 }
  0x97   : > { %569 = vmatpush.xpose.msra.mxu1 %v527_v7 }
  0x98   : > { %742 = vmatpush.bf16.msrb.mxu0 %v1620_v9  ;;  %v1604_v9 = vld [vmem:[%s2266_s23 + $0x20] sm:$0xff] }
  0x9a   : > { %787 = vmatmul.bf16.gmra.mxu2 %v1608_v37 }
  0x9b   : > { %570 = vmatpush.xpose.msra.mxu1 %v526_v8 }
  0x9c   : > { %743 = vmatpush.bf16.msrb.mxu0 %v1619_v11  ;;  %v493_v11 = vld [vmem:[%s2266_s23 + $0x48] sm:$0xff]  }
  0x9d   : > { %v525_v12 = vunpack.c.h.bf16 %v493_v11  ;;  %v524_v13 = vunpack.c.l.bf16 %v493_v11 }
  0x9f   : > { %571 = vmatpush.xpose.msra.mxu1 %v525_v12 }
  0xa0   : > { %744 = vmatpush.bf16.msrb.mxu0 %v1618_v14 }
  0xa3   : > { %572 = vmatpush.xpose.msra.mxu1 %v524_v13 }
  0xa4   : > { %745 = vmatpush.bf16.msrb.mxu0 %v1617_v16  ;;  %v491_v16 = vld [vmem:[%s2266_s23 + $0x44] sm:$0xf]  ;;  %s1995_s23 = scalar_lea.hbm %s1994_s5, 2 }
  0xa5   : > { %v523_v17 = vunpack.c.l.bf16 %v491_v16  ;;  %p1996_p1 = scmp.ne.s32.totalorder %s1994_s5, %s1995_s23  ;;  %p2001_p7 = scmp.lt.s32.totalorder %s1999_s22, %s1995_s23 }
  0xa7   : > { %573 = vmatpush.xpose.msra.mxu1 %v523_v17  ;;  %p1997_p3 = pnand %p1996_p1, %p2228_p5  ;;  %p2002_p8 = por %p2001_p7, %p2000_p12 }
  0xa8   : > { %746 = vmatpush.bf16.msrb.mxu0 %v1616_v19  ;;  %v2348_v19 = vld [vmem:[#allocation9] ss:$0 sm:$0xff] }
  0xa9   : > { %p1998_p4 = pneg %p1997_p3 }
  0xaa   : > { %792 = vmatmul.bf16.gmra.mxu2 %v1609_v39 }
  0xab   : > { %747 = vmatmul.bf16.vlgmr.msrb.gmra.mxu0 %v1600_v38  ;;  %574 = vmatpush.xpose.msra.mxu1 %v522_v20  ;;  %p2003_p9 = pnand %p2002_p8, %p1998_p4 }
  0xae   : > { %575 = vmatmul.f32.vlgmr.msra.gmra.mxu1 %v2299_v36 }
  0xaf   : > { %1012 = vmatpush.bf16.msrb.mxu1 %v2308_v45 }
  0xb3   : > { %1013 = vmatpush.bf16.msrb.mxu1 %v2312_v47 }
  0xb7   : > { %1014 = vmatpush.bf16.msrb.mxu1 %v2316_v51 }
  0xba   : > { %797 = vmatmul.bf16.gmra.mxu2 %v1610_v41 }
  0xbb   : > { %752 = vmatmul.bf16.gmra.mxu0 %v1601_v40  ;;  %1015 = vmatpush.bf16.msrb.mxu1 %v2321_v55 }
  0xbf   : > { %1016 = vmatpush.bf16.msrb.mxu1 %v2324_v57 }
  0xc3   : > { %1017 = vmatpush.bf16.msrb.mxu1 %v2328_v60 }
  0xc7   : > { %1018 = vmatpush.bf16.msrb.mxu1 %v2332_v63 }
  0xca   : > { %802 = vmatmul.bf16.gmra.mxu2 %v1611_v52 }
  0xcb   : > { %757 = vmatmul.bf16.gmra.mxu0 %v1602_v50  ;;  %1019 = vmatpush.bf16.msrb.mxu1 %v1624_v4 }
  0xda   : > { %807 = vmatmul.bf16.gmra.mxu2 %v1612_v1 }
  0xdb   : > { %762 = vmatmul.bf16.gmra.mxu0 %v1603_v62 }
  0xea   : > { %812 = vmatmul.bf16.gmra.mxu2 %v1613_v10 }
  0xeb   : > { %767 = vmatmul.bf16.gmra.mxu0 %v1604_v9 }
  0xed   : > { %v773_v14 = vpop.f32.mrf.mxu2 }
  0xee   : > { %v842_v18 = vmul.f32 %v2344_v15, %v773_v14 }
  0xf0   : > { %v878_v22 = vadd.f32 %v2348_v19, %v842_v18 }
  0xf2   : > { %v910_v26 = vmax.f32 %v878_v22, 0.0 }
  0xf5   : > { %v775_v21 = vpop.f32.mrf.mxu2 }
  0xf6   : > { %v843_v23 = vmul.f32 %v2344_v15, %v775_v21 }
  0xf8   : > { %v879_v25 = vadd.f32 %v2348_v19, %v843_v23 }
  0xfa   : > { %v911_v27 = vmax.f32 %v879_v25, 0.0  ;;  %817 = vmatmul.bf16.gmra.mxu2 %v1614_v24 }
  0xfc   : > { %v937_v0 = vpack.c.bf16 %v911_v27, %v910_v26 }
  0xfd   : > { %v778_v28 = vpop.f32.mrf.mxu2 }
  0xfe   : > { %1045 = vmatmul.bf16.vlgmr.msra.gmra.mxu3 %v937_v0  ;;  %v844_v29 = vmul.f32 %v2344_v15, %v778_v28 }
 0x100   : > { %v880_v31 = vadd.f32 %v2348_v19, %v844_v29 }
 0x102   : > { %v912_v35 = vmax.f32 %v880_v31, 0.0 }
 0x105   : > { %v780_v30 = vpop.f32.mrf.mxu2 }
 0x106   : > { %v845_v32 = vmul.f32 %v2344_v15, %v780_v30 }
 0x108   : > { %v881_v34 = vadd.f32 %v2348_v19, %v845_v32  ;;  %v2372_v46 = vpop.f32.mrf.mxu0 }
 0x10a   : > { %v913_v36 = vmax.f32 %v881_v34, 0.0  ;;  %822 = vmatmul.bf16.gmra.mxu2 %v1615_v33 }
 0x10c   : > { %v938_v37 = vpack.c.bf16 %v913_v36, %v912_v35 }
 0x10d   : > { %v783_v38 = vpop.f32.mrf.mxu2 }
 0x10e   : > { %1050 = vmatmul.bf16.gmra.mxu3 %v938_v37  ;;  %v846_v39 = vmul.f32 %v2344_v15, %v783_v38 }
 0x110   : > { %v882_v41 = vadd.f32 %v2348_v19, %v846_v39 }
 0x112   : > { %v914_v44 = vmax.f32 %v882_v41, 0.0 }
 0x115   : > { %v785_v40 = vpop.f32.mrf.mxu2 }
 0x116   : > { %v847_v42 = vmul.f32 %v2344_v15, %v785_v40 }
 0x118   : > { %v883_v43 = vadd.f32 %v2348_v19, %v847_v42 }
 0x11a   : > { %v915_v45 = vmax.f32 %v883_v43, 0.0 }
 0x11c   : > { %v939_v47 = vpack.c.bf16 %v915_v45, %v914_v44 }
 0x11d   : > { %v788_v48 = vpop.f32.mrf.mxu2 }
 0x11e   : > { %1055 = vmatmul.bf16.gmra.mxu3 %v939_v47  ;;  %v848_v49 = vmul.f32 %v2344_v15, %v788_v48 }
 0x120   : > { %v884_v52 = vadd.f32 %v2348_v19, %v848_v49 }
 0x122   : > { %v916_v56 = vmax.f32 %v884_v52, 0.0 }
 0x125   : > { %v790_v51 = vpop.f32.mrf.mxu2 }
 0x126   : > { %v849_v53 = vmul.f32 %v2344_v15, %v790_v51 }
 0x128   : > { %v748_v50 = vpop.f32.mrf.mxu0  ;;  %v885_v55 = vadd.f32 %v2348_v19, %v849_v53 }
 0x129   : > { %v832_v54 = vmul.f32 %v2344_v15, %v748_v50 }
 0x12a   : > { %v917_v57 = vmax.f32 %v885_v55, 0.0 }
 0x12b   : > { %v868_v58 = vadd.f32 %v2348_v19, %v832_v54 }
 0x12c   : > { %v940_v59 = vpack.c.bf16 %v917_v57, %v916_v56 }
 0x12d   : > { %v793_v61 = vpop.f32.mrf.mxu2  ;;  %v900_v63 = vmax.f32 %v868_v58, 0.0 }
 0x12e   : > { %1060 = vmatmul.bf16.gmra.mxu3 %v940_v59  ;;  %v850_v3 = vmul.f32 %v2344_v15, %v793_v61 }
 0x130   : > { %v750_v60 = vpop.f32.mrf.mxu0  ;;  %v886_v7 = vadd.f32 %v2348_v19, %v850_v3 }
 0x131   : > { %v833_v62 = vmul.f32 %v2344_v15, %v750_v60 }
 0x132   : > { %v918_v11 = vmax.f32 %v886_v7, 0.0 }
 0x133   : > { %v869_v1 = vadd.f32 %v2348_v19, %v833_v62 }
 0x135   : > { %v901_v2 = vmax.f32 %v869_v1, 0.0  ;;  %v795_v6 = vpop.f32.mrf.mxu2 }
 0x136   : > { %v851_v8 = vmul.f32 %v2344_v15, %v795_v6 }
 0x137   : > { %v932_v4 = vpack.c.bf16 %v901_v2, %v900_v63 }
 0x138   : > { %v753_v5 = vpop.f32.mrf.mxu0  ;;  %v887_v10 = vadd.f32 %v2348_v19, %v851_v8 }
 0x139   : > { %1020 = vmatmul.bf16.vlgmr.msrb.gmra.mxu1 %v932_v4  ;;  %v834_v9 = vmul.f32 %v2344_v15, %v753_v5 }
 0x13a   : > { %v919_v12 = vmax.f32 %v887_v10, 0.0 }
 0x13b   : > { %v870_v13 = vadd.f32 %v2348_v19, %v834_v9 }
 0x13c   : > { %v941_v14 = vpack.c.bf16 %v919_v12, %v918_v11 }
 0x13d   : > { %v798_v17 = vpop.f32.mrf.mxu2  ;;  %v902_v20 = vmax.f32 %v870_v13, 0.0 }
 0x13e   : > { %1065 = vmatmul.bf16.gmra.mxu3 %v941_v14  ;;  %v852_v23 = vmul.f32 %v2344_v15, %v798_v17 }
 0x140   : > { %v755_v16 = vpop.f32.mrf.mxu0  ;;  %v888_v27 = vadd.f32 %v2348_v19, %v852_v23 }
 0x141   : > { %v835_v18 = vmul.f32 %v2344_v15, %v755_v16 }
 0x142   : > { %v920_v30 = vmax.f32 %v888_v27, 0.0 }
 0x143   : > { %v871_v21 = vadd.f32 %v2348_v19, %v835_v18 }
 0x145   : > { %v903_v22 = vmax.f32 %v871_v21, 0.0  ;;  %v800_v26 = vpop.f32.mrf.mxu2 }
 0x146   : > { %v853_v0 = vmul.f32 %v2344_v15, %v800_v26 }
 0x147   : > { %v933_v24 = vpack.c.bf16 %v903_v22, %v902_v20 }
 0x148   : > { %v758_v25 = vpop.f32.mrf.mxu0  ;;  %v889_v29 = vadd.f32 %v2348_v19, %v853_v0 }
 0x149   : > { %1025 = vmatmul.bf16.gmra.mxu1 %v933_v24  ;;  %v836_v28 = vmul.f32 %v2344_v15, %v758_v25 }
 0x14a   : > { %v921_v31 = vmax.f32 %v889_v29, 0.0 }
 0x14b   : > { %v872_v32 = vadd.f32 %v2348_v19, %v836_v28 }
 0x14c   : > { %v942_v33 = vpack.c.bf16 %v921_v31, %v920_v30 }
 0x14d   : > { %v803_v35 = vpop.f32.mrf.mxu2  ;;  %v904_v37 = vmax.f32 %v872_v32, 0.0 }
 0x14e   : > { %1070 = vmatmul.bf16.gmra.mxu3 %v942_v33  ;;  %v854_v40 = vmul.f32 %v2344_v15, %v803_v35 }
 0x150   : > { %v760_v34 = vpop.f32.mrf.mxu0  ;;  %v890_v44 = vadd.f32 %v2348_v19, %v854_v40 }
 0x151   : > { %v837_v36 = vmul.f32 %v2344_v15, %v760_v34 }
 0x152   : > { %v922_v49 = vmax.f32 %v890_v44, 0.0 }
 0x153   : > { %v873_v38 = vadd.f32 %v2348_v19, %v837_v36 }
 0x155   : > { %v905_v39 = vmax.f32 %v873_v38, 0.0  ;;  %v805_v43 = vpop.f32.mrf.mxu2 }
 0x156   : > { %v855_v45 = vmul.f32 %v2344_v15, %v805_v43 }
 0x157   : > { %v934_v41 = vpack.c.bf16 %v905_v39, %v904_v37 }
 0x158   : > { %v763_v42 = vpop.f32.mrf.mxu0  ;;  %v891_v48 = vadd.f32 %v2348_v19, %v855_v45 }
 0x159   : > { %1030 = vmatmul.bf16.gmra.mxu1 %v934_v41  ;;  %v838_v47 = vmul.f32 %v2344_v15, %v763_v42 }
 0x15a   : > { %v923_v50 = vmax.f32 %v891_v48, 0.0  ;;  %v2426_v48 = vld [vmem:[#allocation12] ss:$0 sm:$0xff] }
 0x15b   : > { %v874_v51 = vadd.f32 %v2348_v19, %v838_v47 }
 0x15c   : > { %v943_v52 = vpack.c.bf16 %v923_v50, %v922_v49  ;;  %v2428_v50 = vpop.f32.mrf.mxu1 }
 0x15d   : > { %v808_v54 = vpop.f32.mrf.mxu2  ;;  %v906_v56 = vmax.f32 %v874_v51, 0.0  ;;  %v2430_v51 = vld [vmem:[#allocation14] ss:$0 sm:$0xff] }
 0x15e   : > { %1075 = vmatmul.bf16.gmra.mxu3 %v943_v52  ;;  %v856_v59 = vmul.f32 %v2344_v15, %v808_v54 }
 0x160   : > { %v765_v53 = vpop.f32.mrf.mxu0  ;;  %v892_v63 = vadd.f32 %v2348_v19, %v856_v59 }
 0x161   : > { %v839_v55 = vmul.f32 %v2344_v15, %v765_v53 }
 0x162   : > { %v924_v4 = vmax.f32 %v892_v63, 0.0 }
 0x163   : > { %v875_v57 = vadd.f32 %v2348_v19, %v839_v55 }
 0x165   : > { %v907_v58 = vmax.f32 %v875_v57, 0.0  ;;  %v810_v62 = vpop.f32.mrf.mxu2 }
 0x166   : > { %v857_v1 = vmul.f32 %v2344_v15, %v810_v62 }
 0x167   : > { %v935_v60 = vpack.c.bf16 %v907_v58, %v906_v56 }
 0x168   : > { %v768_v61 = vpop.f32.mrf.mxu0  ;;  %v893_v3 = vadd.f32 %v2348_v19, %v857_v1 }
 0x169   : > { %1035 = vmatmul.bf16.gmra.mxu1 %v935_v60  ;;  %v840_v2 = vmul.f32 %v2344_v15, %v768_v61 }
 0x16a   : > { %v925_v5 = vmax.f32 %v893_v3, 0.0 }
 0x16b   : > { %v876_v6 = vadd.f32 %v2348_v19, %v840_v2 }
 0x16c   : > { %v944_v7 = vpack.c.bf16 %v925_v5, %v924_v4 }
 0x16d   : > { %v813_v9 = vpop.f32.mrf.mxu2  ;;  %v908_v11 = vmax.f32 %v876_v6, 0.0 }
 0x16e   : > { %1080 = vmatmul.bf16.gmra.mxu3 %v944_v7  ;;  %v858_v14 = vmul.f32 %v2344_v15, %v813_v9 }
 0x170   : > { %v770_v8 = vpop.f32.mrf.mxu0  ;;  %v894_v18 = vadd.f32 %v2348_v19, %v858_v14 }
 0x171   : > { %v841_v10 = vmul.f32 %v2344_v15, %v770_v8 }
 0x172   : > { %v926_v22 = vmax.f32 %v894_v18, 0.0 }
 0x173   : > { %v877_v12 = vadd.f32 %v2348_v19, %v841_v10 }
 0x175   : > { %v909_v13 = vmax.f32 %v877_v12, 0.0  ;;  %v815_v17 = vpop.f32.mrf.mxu2 }
 0x176   : > { %v859_v20 = vmul.f32 %v2344_v15, %v815_v17 }
 0x177   : > { %v936_v16 = vpack.c.bf16 %v909_v13, %v908_v11 }
 0x178   : > { %v895_v21 = vadd.f32 %v2348_v19, %v859_v20 }
 0x179   : > { %1040 = vmatmul.bf16.gmra.mxu1 %v936_v16 }
 0x17a   : > { %v927_v23 = vmax.f32 %v895_v21, 0.0 }
 0x17c   : > { %v945_v24 = vpack.c.bf16 %v927_v23, %v926_v22 }
 0x17d   : > { %v818_v25 = vpop.f32.mrf.mxu2 }
 0x17e   : > { %1085 = vmatmul.bf16.gmra.mxu3 %v945_v24  ;;  %v860_v27 = vmul.f32 %v2344_v15, %v818_v25 }
 0x180   : > { %v896_v28 = vadd.f32 %v2348_v19, %v860_v27 }
 0x181   : > { %v1046_v26 = vpop.f32.mrf.mxu3 }
 0x182   : > { %v928_v32 = vmax.f32 %v896_v28, 0.0  ;;  %v1115_v2 = vmul.f32 %v2426_v48, %v1046_v26 }
 0x184   : > { %v1151_v6 = vadd.f32 %v2430_v51, %v1115_v2 }
 0x185   : > { %v820_v0 = vpop.f32.mrf.mxu2 }
 0x186   : > { %v861_v29 = vmul.f32 %v2344_v15, %v820_v0  ;;  %v1183_v9 = vmax.f32 %v1151_v6, 0.0 }
 0x188   : > { %v897_v30 = vadd.f32 %v2348_v19, %v861_v29 }
 0x189   : > { %v1048_v31 = vpop.f32.mrf.mxu3 }
 0x18a   : > { %v929_v33 = vmax.f32 %v897_v30, 0.0  ;;  %v1116_v61 = vmul.f32 %v2426_v48, %v1048_v31 }
 0x18c   : > { %v946_v34 = vpack.c.bf16 %v929_v33, %v928_v32  ;;  %v1152_v3 = vadd.f32 %v2430_v51, %v1116_v61 }
 0x18d   : > { %v823_v35 = vpop.f32.mrf.mxu2 }
 0x18e   : > { %1090 = vmatmul.bf16.gmra.mxu3 %v946_v34  ;;  %v862_v37 = vmul.f32 %v2344_v15, %v823_v35  ;;  %v1184_v7 = vmax.f32 %v1152_v3, 0.0  ;;  %v2490_v3 = vld [vmem:[%s2586_s8] sm:$0xff] }
 0x190   : > { %v898_v39 = vadd.f32 %v2348_v19, %v862_v37 }
 0x191   : > { %v1051_v36 = vpop.f32.mrf.mxu3 }
 0x192   : > { %v930_v43 = vmax.f32 %v898_v39, 0.0  ;;  %v1117_v57 = vmul.f32 %v2426_v48, %v1051_v36 }
 0x194   : > { %v1153_v62 = vadd.f32 %v2430_v51, %v1117_v57 }
 0x195   : > { %v825_v38 = vpop.f32.mrf.mxu2 }
 0x196   : > { %v863_v40 = vmul.f32 %v2344_v15, %v825_v38  ;;  %v1185_v4 = vmax.f32 %v1153_v62, 0.0 }
 0x198   : > { %v899_v41 = vadd.f32 %v2348_v19, %v863_v40 }
 0x199   : > { %v1053_v42 = vpop.f32.mrf.mxu3 }
 0x19a   : > { %v931_v44 = vmax.f32 %v899_v41, 0.0  ;;  %v1118_v19 = vmul.f32 %v2426_v48, %v1053_v42 }
 0x19c   : > { %v947_v45 = vpack.c.bf16 %v931_v44, %v930_v43  ;;  %v1154_v58 = vadd.f32 %v2430_v51, %v1118_v19 }
 0x19e   : > { %1095 = vmatmul.bf16.gmra.mxu3 %v947_v45  ;;  %v1186_v63 = vmax.f32 %v1154_v58, 0.0 }
 0x1a1   : > { %v1056_v47 = vpop.f32.mrf.mxu3 }
 0x1a2   : > { %v1119_v52 = vmul.f32 %v2426_v48, %v1056_v47 }
 0x1a4   : > { %v1155_v54 = vadd.f32 %v2430_v51, %v1119_v52 }
 0x1a6   : > { %v1187_v59 = vmax.f32 %v1155_v54, 0.0 }
 0x1a9   : > { %v1058_v49 = vpop.f32.mrf.mxu3 }
 0x1aa   : > { %v1120_v53 = vmul.f32 %v2426_v48, %v1058_v49 }
 0x1ac   : > { %v1156_v15 = vadd.f32 %v2430_v51, %v1120_v53 }
 0x1ae   : > { %v1188_v55 = vmax.f32 %v1156_v15, 0.0 }
 0x1b0   : > { %1206 = vmatpush.xpose.msra.mxu0 %v1188_v55 }
 0x1b1   : > { %v2437_v56 = vpop.f32.mrf.mxu3 }
 0x1b4   : > { %1207 = vmatpush.xpose.msra.mxu0 %v1187_v59 }
 0x1b6   : > { %v2441_v60 = vpop.f32.mrf.mxu1 }
 0x1b7   : > { %v1105_v57 = vmul.f32 %v2426_v48, %v2441_v60 }
 0x1b8   : > { %1208 = vmatpush.xpose.msra.mxu0 %v1186_v63 }
 0x1b9   : > { %v2445_v1 = vpop.f32.mrf.mxu3  ;;  %v1141_v61 = vadd.f32 %v2430_v51, %v1105_v57  ;;  %v1249_v57 = vstv %s1248_s28 }
 0x1bb   : > { %v1173_v2 = vmax.f32 %v1141_v61, 0.0 }
 0x1bc   : > { %1209 = vmatpush.xpose.msra.mxu0 %v1185_v4 }
 0x1be   : > { %v1023_v5 = vpop.f32.mrf.mxu1 }
 0x1bf   : > { %v1106_v15 = vmul.f32 %v2426_v48, %v1023_v5 }
 0x1c0   : > { %1210 = vmatpush.xpose.msra.mxu0 %v1184_v7 }
 0x1c1   : > { %v2450_v8 = vpop.f32.mrf.mxu3  ;;  %v1142_v58 = vadd.f32 %v2430_v51, %v1106_v15 }
 0x1c3   : > { %v1174_v62 = vmax.f32 %v1142_v58, 0.0 }
 0x1c4   : > { %1211 = vmatpush.xpose.msra.mxu0 %v1183_v9 }
 0x1c6   : > { %v1026_v10 = vpop.f32.mrf.mxu1 }
 0x1c7   : > { %v1107_v52 = vmul.f32 %v2426_v48, %v1026_v10 }
 0x1c9   : > { %v2452_v11 = vpop.f32.mrf.mxu3  ;;  %v1143_v19 = vadd.f32 %v2430_v51, %v1107_v52 }
 0x1cb   : > { %v1175_v59 = vmax.f32 %v1143_v19, 0.0 }
 0x1ce   : > { %v1028_v12 = vpop.f32.mrf.mxu1 }
 0x1cf   : > { %v1108_v45 = vmul.f32 %v2426_v48, %v1028_v12 }
 0x1d1   : > { %v2454_v13 = vpop.f32.mrf.mxu3  ;;  %v1144_v53 = vadd.f32 %v2430_v51, %v1108_v45 }
 0x1d3   : > { %v1176_v54 = vmax.f32 %v1144_v53, 0.0 }
 0x1d6   : > { %v1031_v14 = vpop.f32.mrf.mxu1 }
 0x1d7   : > { %v1109_v40 = vmul.f32 %v2426_v48, %v1031_v14 }
 0x1d9   : > { %v2456_v16 = vpop.f32.mrf.mxu3  ;;  %v1145_v43 = vadd.f32 %v2430_v51, %v1109_v40 }
 0x1db   : > { %v1177_v49 = vmax.f32 %v1145_v43, 0.0 }
 0x1de   : > { %v1033_v17 = vpop.f32.mrf.mxu1 }
 0x1df   : > { %v1110_v36 = vmul.f32 %v2426_v48, %v1033_v17 }
 0x1e1   : > { %v2458_v18 = vpop.f32.mrf.mxu3  ;;  %v1146_v41 = vadd.f32 %v2430_v51, %v1110_v36 }
 0x1e3   : > { %v1178_v44 = vmax.f32 %v1146_v41, 0.0 }
 0x1e6   : > { %v1036_v20 = vpop.f32.mrf.mxu1 }
 0x1e7   : > { %v1111_v33 = vmul.f32 %v2426_v48, %v1036_v20 }
 0x1e9   : > { %v2460_v21 = vpop.f32.mrf.mxu3  ;;  %v1147_v37 = vadd.f32 %v2430_v51, %v1111_v33 }
 0x1eb   : > { %v1179_v42 = vmax.f32 %v1147_v37, 0.0 }
 0x1ee   : > { %v1038_v22 = vpop.f32.mrf.mxu1 }
 0x1ef   : > { %v1112_v28 = vmul.f32 %v2426_v48, %v1038_v22 }
 0x1f1   : > { %v2462_v23 = vpop.f32.mrf.mxu3  ;;  %v1148_v34 = vadd.f32 %v2430_v51, %v1112_v28 }
 0x1f3   : > { %v1180_v38 = vmax.f32 %v1148_v34, 0.0 }
 0x1f6   : > { %v1041_v24 = vpop.f32.mrf.mxu1 }
 0x1f7   : > { %v1113_v26 = vmul.f32 %v2426_v48, %v1041_v24 }
 0x1f9   : > { %v2464_v25 = vpop.f32.mrf.mxu3  ;;  %v1149_v29 = vadd.f32 %v2430_v51, %v1113_v26 }
 0x1fa   : > { %v1130_v28 = vmul.f32 %v2426_v48, %v2464_v25  ;;  %v1127_v25 = vmul.f32 %v2426_v48, %v2458_v18  ;;  %v1124_v18 = vmul.f32 %v2426_v48, %v2452_v11  ;;  %v1121_v11 = vmul.f32 %v2426_v48, %v2437_v56 }
 0x1fb   : > { %v1181_v35 = vmax.f32 %v1149_v29, 0.0 }
 0x1fc   : > { %v1166_v33 = vadd.f32 %v2430_v51, %v1130_v28  ;;  %v1160_v45 = vadd.f32 %v2430_v51, %v1124_v18 }
 0x1fe   : > { %v1043_v27 = vpop.f32.mrf.mxu1  ;;  %v1198_v36 = vmax.f32 %v1166_v33, 0.0  ;;  %v1192_v52 = vmax.f32 %v1160_v45, 0.0 }
 0x1ff   : > { %v1114_v0 = vmul.f32 %v2426_v48, %v1043_v27 }
 0x201   : > { %v1150_v30 = vadd.f32 %v2430_v51, %v1114_v0  ;;  %v1086_v32 = vpop.f32.mrf.mxu3 }
 0x202   : > { %v1131_v26 = vmul.f32 %v2426_v48, %v1086_v32  ;;  %v1128_v32 = vmul.f32 %v2426_v48, %v2460_v21  ;;  %v1125_v21 = vmul.f32 %v2426_v48, %v2454_v13  ;;  %v1122_v13 = vmul.f32 %v2426_v48, %v2445_v1 }
 0x203   : > { %v1182_v31 = vmax.f32 %v1150_v30, 0.0 }
 0x204   : > { %v1167_v29 = vadd.f32 %v2430_v51, %v1131_v26  ;;  %v1164_v37 = vadd.f32 %v2430_v51, %v1128_v32  ;;  %v1161_v43 = vadd.f32 %v2430_v51, %v1125_v21  ;;  %v1158_v53 = vadd.f32 %v2430_v51, %v1122_v13 }
 0x205   : > { %1212 = vmatpush.xpose.msra.mxu0 %v1182_v31  ;;  %v1129_v31 = vmul.f32 %v2426_v48, %v2462_v23  ;;  %v1126_v23 = vmul.f32 %v2426_v48, %v2456_v16  ;;  %v1123_v16 = vmul.f32 %v2426_v48, %v2450_v8  ;;  %v1157_v8 = vadd.f32 %v2430_v51, %v1121_v11 }
 0x206   : > { %v1199_v34 = vmax.f32 %v1167_v29, 0.0  ;;  %v1196_v40 = vmax.f32 %v1164_v37, 0.0  ;;  %v1190_v19 = vmax.f32 %v1158_v53, 0.0  ;;  %v1296_v26 = vlaneseq }
 0x207   : > { %v1162_v41 = vadd.f32 %v2430_v51, %v1126_v23 }
 0x208   : > { %vm1298_vm9 = vcmp.lt.s32.totalorder %v1296_v26, 256 }
 0x209   : > { %1213 = vmatpush.xpose.msra.mxu0 %v1181_v35  ;;  %v1088_v39 = vpop.f32.mrf.mxu3  ;;  %v1165_v35 = vadd.f32 %v2430_v51, %v1129_v31 }
 0x20a   : > { %v1132_v20 = vmul.f32 %v2426_v48, %v1088_v39  ;;  %v1163_v39 = vadd.f32 %v2430_v51, %v1127_v25 }
 0x20c   : > { %v1168_v27 = vadd.f32 %v2430_v51, %v1132_v20 }
 0x20d   : > { %1214 = vmatpush.xpose.msra.mxu0 %v1180_v38  ;;  %v1197_v38 = vmax.f32 %v1165_v35, 0.0 }
 0x20e   : > { %v1200_v30 = vmax.f32 %v1168_v27, 0.0 }
 0x211   : > { %1215 = vmatpush.xpose.msra.mxu0 %v1179_v42  ;;  %v1091_v47 = vpop.f32.mrf.mxu3  ;;  %v1195_v42 = vmax.f32 %v1163_v39, 0.0 }
 0x212   : > { %v1133_v12 = vmul.f32 %v2426_v48, %v1091_v47  ;;  %v1193_v47 = vmax.f32 %v1161_v43, 0.0 }
 0x214   : > { %v1169_v22 = vadd.f32 %v2430_v51, %v1133_v12 }
 0x215   : > { %1216 = vmatpush.xpose.msra.mxu0 %v1178_v44  ;;  %v1194_v44 = vmax.f32 %v1162_v41, 0.0 }
 0x216   : > { %v1201_v0 = vmax.f32 %v1169_v22, 0.0 }
 0x219   : > { %1217 = vmatpush.xpose.msra.mxu0 %v1177_v49  ;;  %v1093_v55 = vpop.f32.mrf.mxu3  ;;  %v1159_v49 = vadd.f32 %v2430_v51, %v1123_v16 }
 0x21a   : > { %v1134_v7 = vmul.f32 %v2426_v48, %v1093_v55 }
 0x21b   : > { %v1191_v15 = vmax.f32 %v1159_v49, 0.0 }
 0x21c   : > { %v1170_v14 = vadd.f32 %v2430_v51, %v1134_v7 }
 0x21d   : > { %1218 = vmatpush.xpose.msra.mxu0 %v1176_v54  ;;  %v1189_v54 = vmax.f32 %v1157_v8, 0.0 }
 0x21e   : > { %v1202_v24 = vmax.f32 %v1170_v14, 0.0 }
 0x221   : > { %1219 = vmatpush.xpose.msra.mxu0 %v1175_v59  ;;  %v1096_v63 = vpop.f32.mrf.mxu3 }
 0x222   : > { %v1135_v60 = vmul.f32 %v2426_v48, %v1096_v63 }
 0x224   : > { %v1171_v9 = vadd.f32 %v2430_v51, %v1135_v60 }
 0x225   : > { %1220 = vmatpush.xpose.msra.mxu0 %v1174_v62 }
 0x226   : > { %v1203_v17 = vmax.f32 %v1171_v9, 0.0 }
 0x229   : > { %1221 = vmatpush.xpose.msra.mxu0 %v1173_v2  ;;  %v1098_v4 = vpop.f32.mrf.mxu3 }
 0x22a   : > { %v1136_v5 = vmul.f32 %v2426_v48, %v1098_v4 }
 0x22c   : > { %1222 = vmatmul.f32.vlgmr.msra.gmra.mxu0 %v2490_v3  ;;  %v1172_v6 = vadd.f32 %v2430_v51, %v1136_v5 }
 0x22e   : > { %v1204_v10 = vmax.f32 %v1172_v6, 0.0 }
 0x230   : > { %1226 = vmatpush.xpose.msra.mxu1 %v1204_v10 }
 0x234   : > { %1227 = vmatpush.xpose.msra.mxu1 %v1203_v17 }
 0x238   : > { %1228 = vmatpush.xpose.msra.mxu1 %v1202_v24 }
 0x23c   : > { %1229 = vmatpush.xpose.msra.mxu1 %v1201_v0 }
 0x240   : > { %1230 = vmatpush.xpose.msra.mxu1 %v1200_v30 }
 0x244   : > { %1231 = vmatpush.xpose.msra.mxu1 %v1199_v34 }
 0x248   : > { %1232 = vmatpush.xpose.msra.mxu1 %v1198_v36 }
 0x24c   : > { %1233 = vmatpush.xpose.msra.mxu1 %v1197_v38 }
 0x250   : > { %1234 = vmatpush.xpose.msra.mxu1 %v1196_v40 }
 0x254   : > { %1235 = vmatpush.xpose.msra.mxu1 %v1195_v42 }
 0x258   : > { %1236 = vmatpush.xpose.msra.mxu1 %v1194_v44 }
 0x25c   : > { %1237 = vmatpush.xpose.msra.mxu1 %v1193_v47 }
 0x260   : > { %1238 = vmatpush.xpose.msra.mxu1 %v1192_v52 }
 0x264   : > { %1239 = vmatpush.xpose.msra.mxu1 %v1191_v15 }
 0x268   : > { %1240 = vmatpush.xpose.msra.mxu1 %v1190_v19 }
 0x26c   : > { %1241 = vmatpush.xpose.msra.mxu1 %v1189_v54 }
 0x26f   : > { %1242 = vmatmul.f32.vlgmr.msra.gmra.mxu1 %v2490_v3 }
 0x2a9   : > { %v1223_v1 = vpop.f32.mrf.mxu0 }
 0x2aa   : > { %v1246_v55 = vadd.f32 %v1223_v1, %v2372_v46 }
 0x2ac   : > { %v1250_v58 = vadd.f32 %v1249_v57, %v1246_v55 }
 0x2ae   : > { %v1593_v59 = vmul.f32 -1.442695, %v1250_v58 }
 0x2b0   : > { %1761 = vpow2.f32 %v1593_v59 }
 0x2b6   : > { %v1762_v48 = vpop.eup %1761 }
 0x2b7   : > { %v1258_v51 = vadd.f32 1.0, %v1762_v48 }
 0x2b9   : > { %1763 = vrcp.f32 %v1258_v51  ;;  %vm1265_vm2 = vweird.f32 %v1258_v51  ;;  %v1271_v17 = vand.u32 2147483648, %v1258_v51  ;;  %v1269_v22 = vand.u32 2147483647, %v1258_v51 }
 0x2bb   : > { %v1272_v29 = vor.u32 1.1754944e-38, %v1271_v17  ;;  %vm1270_vm8 = vcmp.eq.f32.partialorder %v1269_v22, 8.507059e+37 }
 0x2bf   : > { %v1764_v2 = vpop.eup %1763 }
 0x2c0   : > { %v1261_v60 = vmul.f32 %v1764_v2, %v1258_v51  ;;  %vm1266_vm0 = vweird.f32 %v1764_v2 }
 0x2c1   : > { %vm2543_vm4 = vmor %vm1265_vm2, %vm1266_vm0 }
 0x2c2   : > { %v1262_v46 = vsub.f32 1.0, %v1261_v60 }
 0x2c4   : > { %v1263_v6 = vmul.f32 %v1764_v2, %v1262_v46 }
 0x2c6   : > { %v1264_v12 = vadd.f32 %v1764_v2, %v1263_v6 }
 0x2c8   : > { %v1268_v0 = vsel %vm2543_vm4, %v1764_v2, %v1264_v12 }
 0x2c9   : > { %v1273_v33 = vsel %vm1270_vm8, %v1272_v29, %v1268_v0 }
 0x2ec   : > { %v1243_v56 = vpop.f32.mrf.mxu1 }
 0x2ed   : > { %v1247_v61 = vadd.f32 %v1243_v56, %v2428_v50 }
 0x2ef   : > { %v1251_v62 = vadd.f32 %v1249_v57, %v1247_v61 }
 0x2f1   : > { %v1594_v63 = vmul.f32 -1.442695, %v1251_v62 }
 0x2f3   : > { %1765 = vpow2.f32 %v1594_v63 }
 0x2f9   : > { %v1766_v3 = vpop.eup %1765 }
 0x2fa   : > { %v1259_v4 = vadd.f32 1.0, %v1766_v3 }
 0x2fc   : > { %1767 = vrcp.f32 %v1259_v4  ;;  %v1286_v50 = vand.u32 2147483648, %v1259_v4  ;;  %v1284_v14 = vand.u32 2147483647, %v1259_v4  ;;  %vm1280_vm3 = vweird.f32 %v1259_v4 }
 0x2fe   : > { %v1287_v27 = vor.u32 1.1754944e-38, %v1286_v50  ;;  %vm1285_vm6 = vcmp.eq.f32.partialorder %v1284_v14, 8.507059e+37 }
 0x302   : > { %v1768_v5 = vpop.eup %1767 }
 0x303   : > { %v1276_v7 = vmul.f32 %v1768_v5, %v1259_v4  ;;  %vm1281_vm1 = vweird.f32 %v1768_v5 }
 0x304   : > { %vm1282_vm5 = vmor %vm1280_vm3, %vm1281_vm1 }
 0x305   : > { %v1277_v9 = vsub.f32 1.0, %v1276_v7 }
 0x307   : > { %v1278_v10 = vmul.f32 %v1768_v5, %v1277_v9 }
 0x309   : > { %v1279_v24 = vadd.f32 %v1768_v5, %v1278_v10 }
 0x30b   : > { %v1283_v28 = vsel %vm1282_vm5, %v1768_v5, %v1279_v24 }
 0x30c   : > { %v1288_v30 = vsel %vm1285_vm6, %v1287_v27, %v1283_v28 }
 0x30d   : > { %v1292_v31 = vrot.slane %v1288_v30, 7 }
 0x30f   : > { %v1294_v34 = vsel %vm1293_vm7, %v1273_v33, %v1292_v31 }
 0x310   : > { %1300 = vst.msk [vmem:[%s471_s21] sm:$0x3] %vm1298_vm9, %v1294_v34 }
 0x311   : > { %2006 = shalt.err (!%p2003_p9)
}
 0x312   : > { %1674 = dma.vmem_to_hbm [thread:$0]  (%p2228_p5), %s1315_s13, 32, %s1317_s24, %s1302_s4  }
 0x313 PF: > { %s1328_s27 = sand.u32 1, %s2045_s15   ;;  %p2610_p10 = scmp.ge.s32.totalorder %s2057_s18, 2 }
 0x314   : > { %s1329_s26 = scalar_lea.sflag [#allocation5], %s1328_s27 }
 0x315   : > { %p1700_p13 = pnand %p2610_p10, %p2232_p6 }
 0x317   : > { %p1701_p11 = pneg %p1700_p13 }
 0x319   : > { %2040 = dma.done.wait (%p1701_p11), %s1329_s26, 32  }
 0x31a   : > { %2042 = vsyncadd (%p1701_p11), %s1329_s26, 4294967264  ;;  %p27_p0 = scmp.ge.s32.totalorder %s2202_s29, 4   ;;  %s2611_s15 = smov %s2049_s16 }
 0x31b   : > { %s2612_s16 = smov %s2053_s17  ;;  %s2613_s17 = smov %s2213_s30 }
 0x31c   : > { %s2614_s18 = smov %s2202_s29  ;;  %29 = sbr.rel (!%p27_p0) target bundleno = 14 (0xe), region = 129 }
 0x321   :  { %1335 = vsyncpa [#allocation4], 1 }
 0x322   :  { %1337 = vsyncpa [#allocation4 + $0x1], 1 }
 0x323   :  { %1338 = vsyncpa [#allocation7], 1 }
 0x324   :  { %1339 = vsyncpa [#allocation10], 1 }
 0x325   :  { %1340 = vsyncpa [#allocation13], 1 }
 0x326   :  { %1341 = vsyncpa [#allocation5], 1 }
 0x327   :  { %1343 = vsyncpa [#allocation5 + $0x1], 1 }

// kernel: tpu_custom_call.1
= control target key start
LH: loop header
LB: loop body
LE: loop exit
PB: predicated region body
PF: predicated region fallthrough
CT: control target
= control target key end

     0   :  { %s2578_s0 = inlined_call_operand.hbm [shape: bf16[512,128], index: 0, kind: input, shape index: {}]   ;;  %s2579_s1 = inlined_call_operand.hbm [shape: f32[8,128], index: 1, kind: input, shape index: {}]   ;;  %s2580_s2 = inlined_call_operand.hbm [shape: bf16[128,128], index: 2, kind: input, shape index: {}]   ;;  %s2581_s3 = inlined_call_operand.vmem [shape: f32[1,128], index: 3, kind: input, shape index: {}]   ;;  %s2582_s4 = inlined_call_operand.hbm [shape: f32[1,128], index: 4, kind: input, shape index: {}]   ;;  %s2583_s5 = inlined_call_operand.hbm [shape: bf16[128,128], index: 5, kind: input, shape index: {}]   ;;  %s2584_s6 = inlined_call_operand.hbm [shape: f32[1,128], index: 6, kind: input, shape index: {}]   ;;  %s2585_s7 = inlined_call_operand.hbm [shape: f32[1,128], index: 7, kind: input, shape index: {}]   ;;  %s2586_s8 = inlined_call_operand.vmem [shape: f32[8,128], index: 8, kind: input, shape index: {}]   ;;  %s2587_s9 = inlined_call_operand.<no memory space> [shape: f32[1,1], index: 9, kind: input, shape index: {}]   ;;  %s2588_s10 = inlined_call_operand.hbm [shape: f32[1,512], index: 10, kind: output, shape index: {}]  }
   0x1   :  { %2591 = sst [smem:[#allocation21_spill]] %s2579_s1 }
   0x2   :  { %2592 = sst [smem:[#allocation22_spill]] %s2580_s2 }
   0x3   :  { %2593 = sst [smem:[#allocation23_spill]] %s2582_s4 }
   0x4   :  { %2594 = sst [smem:[#allocation24_spill]] %s2583_s5 }
   0x5   :  { %15 = sst [smem:[#allocation2]] %s2587_s9 }
   0x6   :  { %16 = vsyncpa [#allocation4], 0 }
   0x7   :  { %18 = vsyncpa [#allocation4 + $0x1], 0 }
   0x8   :  { %19 = vsyncpa [#allocation7], 0 }
   0x9   :  { %20 = vsyncpa [#allocation10], 0 }
   0xa   :  { %21 = vsyncpa [#allocation13], 0 }
   0xb   :  { %22 = vsyncpa [#allocation5], 0 }
   0xc   :  { %24 = vsyncpa [#allocation5 + $0x1], 0  ;;  %s2125_s15 = smov 0   ;;  %s2127_s16 = smov 0  }
   0xd   :  { %s2129_s17 = smov 0   ;;  %s2131_s18 = smov 0  }
   0xe LB: > { %s2595_s1 = sld [smem:[#allocation21_spill]]  ;;  %s2149_s21 = sadd.s32 4294967295, %s2057_s18   ;;  %s2057_s18 = sphi %s2131_s18, %s2614_s18   ;;  %s2053_s17 = sphi %s2129_s17, %s2613_s17   ;;  %s2049_s16 = sphi %s2127_s16, %s2612_s16   ;;  %s2045_s15 = sphi %s2125_s15, %s2611_s15  }
   0xf   : > { %p1445_p0 = scmp.ge.s32.totalorder %s2057_s18, 1  ;;  %p51_p1 = scmp.eq.s32.totalorder %s2149_s21, 0 }
  0x10   : > { %p276_p2 = scmp.lt.s32.totalorder %s2057_s18, 3  ;;  %s2059_s23 = smov [#allocation6]  }
  0x11   : > { %s290_s24 = sshll.u32 %s2059_s23, 4  ;;  %s2597_s4 = sld [smem:[#allocation23_spill]]  ;;  %s291_s24 = int_to_ptr.vmem [resolvable:$true] %s290_s24 }
  0x12   : > { %p2154_p3 = pnand %p1445_p0, %p276_p2  ;;  %s2060_s29 = smov [#allocation9]  }
  0x13   : > { %s319_s30 = sshll.u32 %s2060_s29, 4  ;;  %s343_s13 = sshll.u32 %s2584_s6, 4  ;;  %s320_s30 = int_to_ptr.vmem [resolvable:$true] %s319_s30  ;;  %s344_s13 = int_to_ptr.hbm [resolvable:$true] %s343_s13 }
  0x14   : > { %s288_s20 = sshll.u32 %s2595_s1, 4  ;;  %p1676_p5 = pneg %p2154_p3  ;;  %s289_s20 = int_to_ptr.hbm [resolvable:$true] %s288_s20 }
  0x15   : > { %s2599_s2 = sld [smem:[#allocation22_spill]]  ;;  %s2061_s23 = smov [#allocation12]  }
  0x16   : > { %p2166_p6 = pnand %p1676_p5, %p51_p1  ;;  %s345_s25 = sshll.u32 %s2061_s23, 4  ;;  %s346_s25 = int_to_ptr.vmem [resolvable:$true] %s345_s25 }
  0x17   : > { %s317_s27 = sshll.u32 %s2597_s4, 4  ;;  %s2062_s26 = smov [#allocation8]   ;;  %s318_s27 = int_to_ptr.hbm [resolvable:$true] %s317_s27 }
  0x18   : > { %1679 = dma.hbm_to_vmem [thread:$0]  (!%p2166_p6), %s289_s20, 128, %s291_s24, [#allocation7]  }
  0x19   : > { %1685 = dma.hbm_to_vmem [thread:$0]  (!%p2166_p6), %s318_s27, 16, %s320_s30, [#allocation10]  }
  0x1a   : > { %1691 = dma.hbm_to_vmem [thread:$0]  (!%p2166_p6), %s344_s13, 16, %s346_s25, [#allocation13]  }
  0x1b   : > { %s299_s19 = sshll.u32 %s2599_s2, 4  ;;  %s301_s29 = sshll.u32 %s2062_s26, 4  ;;  %s300_s19 = int_to_ptr.hbm [resolvable:$true] %s299_s19  ;;  %s302_s29 = int_to_ptr.vmem [resolvable:$true] %s301_s29 }
  0x1c   : > { %s2589_s11 = smov 64   ;;  %s2590_s20 = smov 4  }
  0x1d   : > { %1682 = dma.hbm_to_vmem [thread:$0]  (!%p2166_p6), %s300_s19, 1024, %s302_s29, [#allocation7], %s2589_s11, %s2589_s11, %s2590_s20  }
  0x1e   : > { %s2600_s5 = sld [smem:[#allocation24_spill]]  ;;  %s2065_s12 = smov [#allocation11]  }
  0x1f   : > { %s330_s13 = sshll.u32 %s2065_s12, 4  ;;  %s355_s23 = sshll.u32 %s2585_s7, 4  ;;  %s331_s13 = int_to_ptr.vmem [resolvable:$true] %s330_s13  ;;  %s356_s23 = int_to_ptr.hbm [resolvable:$true] %s355_s23 }
  0x20   : > { %s2066_s19 = smov [#allocation14]   ;;  %s1444_s26 = sadd.s32 4294967294, %s2057_s18  }
  0x21   : > { %s357_s25 = sshll.u32 %s2066_s19, 4  ;;  %s2202_s29 = sadd.s32 1, %s2057_s18   ;;  %s358_s25 = int_to_ptr.vmem [resolvable:$true] %s357_s25 }
  0x22   : > { %1694 = dma.hbm_to_vmem [thread:$0]  (!%p2166_p6), %s356_s23, 16, %s358_s25, [#allocation13]  }
  0x23   : > { %s34_s24 = ssub.s32 %s2057_s18, %s2202_s29  ;;  %s37_s27 = sadd.s32 1, %s2053_s17 }
  0x24   : > { %s328_s30 = sshll.u32 %s2600_s5, 4  ;;  %p35_p7 = scmp.eq.s32.totalorder %s34_s24, 0  ;;  %s329_s30 = int_to_ptr.hbm [resolvable:$true] %s328_s30 }
  0x25   : > { %1688 = dma.hbm_to_vmem [thread:$0]  (!%p2166_p6), %s329_s30, 1024, %s331_s13, [#allocation10], %s2589_s11, %s2589_s11, %s2590_s20  }
  0x26   : > { %p44_p8 = scmp.ne.s32.totalorder %s2053_s17, %s2049_s16  ;;  %p45_p9 = scmp.eq.s32.totalorder %s2057_s18, 0 }
  0x27   : > { %p50_p10 = scmp.ne.s32.totalorder %s2049_s16, %s2045_s15  ;;  %p263_p13 = scmp.eq.s32.totalorder %s2149_s21, 1 }
  0x28   : > { %s2213_s30 = scalar_select %p35_p7, %s2053_s17, %s37_s27  }
  0x29   : > { %p2215_p11 = por %p45_p9, %p44_p8  ;;  %p2221_p12 = por %p51_p1, %p50_p10 }
  0x2a   : > { %p269_p0 = scmp.eq.s32.totalorder %s1444_s26, 1  ;;  %p1709_p2 = scmp.lt.s32.totalorder %s2057_s18, 2 }
  0x2b   : > { %s374_s13 = sand.u32 1, %s2053_s17   ;;  %p2228_p5 = por %p263_p13, %p44_p8 }
  0x2c   : > { %p2232_p6 = por %p269_p0, %p50_p10  ;;  %s1453_s23 = sshll.u32 %s374_s13, 7 }
  0x2d   : > { %s1599_s19 = sshll.u32 %s2057_s18, 7  ;;  %s378_s11 = scalar_lea.vmem [#allocation3], %s1453_s23 }
  0x2e   : > { %s383_s27 = scalar_lea.hbm %s2578_s0, %s1599_s19  ;;  %s386_s20 = sshll.u32 %s378_s11, 4  ;;  %s387_s20 = int_to_ptr.vmem [resolvable:$true] %s386_s20 }
  0x2f   : > { %s384_s1 = sshll.u32 %s383_s27, 4  ;;  %p2242_p7 = pnand %p1709_p2, %p2215_p11  ;;  %s385_s1 = int_to_ptr.hbm [resolvable:$true] %s384_s1 }
  0x30   : > { %s375_s2 = scalar_lea.sflag [#allocation4], %s374_s13  ;;  %s1949_s4 = sshra.s32 %s385_s1, 4  ;;  %s1950_s4 = int_to_ptr.hbm [resolvable:$true] %s1949_s4 }
  0x31   : > { %s1951_s5 = scalar_lea.hbm %s1950_s4, 128  ;;  %p1953_p9 = pneg %p2242_p7 }
  0x32   : > { %p1952_p8 = scmp.ne.s32.totalorder %s1950_s4, %s1951_s5  ;;  %s1956_s19 = scalar_lea.hbm %s2578_s0, 256 }
  0x33   : > { %p1957_p11 = scmp.lt.s32.totalorder %s1950_s4, %s2578_s0  ;;  %p1958_p0 = scmp.lt.s32.totalorder %s1956_s19, %s1951_s5 }
  0x34   : > { %p1954_p10 = pnand %p1953_p9, %p1952_p8 }
  0x35   : > { %p1959_p2 = por %p1958_p0, %p1957_p11 }
  0x36   : > { %p1955_p13 = pneg %p1954_p10 }
  0x38   : > { %p1960_p4 = pnand %p1959_p2, %p1955_p13 }
  0x3a   : > { %1963 = shalt.err (!%p1960_p4)
}
  0x3b   : > { %s2606_s13 = smov 4   ;;  %s2607_s24 = smov 64  }
  0x3c   : > { %1698 = dma.hbm_to_vmem [thread:$0]  (!%p2242_p7), %s385_s1, 2048, %s387_s20, %s375_s2, %s2607_s24, %s2607_s24, %s2606_s13  }
  0x3d   : > { %398 = sbr.rel (%p2154_p3) target bundleno = 787 (0x313), region = 60  ;;  %s2262_s27 = sand.u32 (!%p2154_p3), 1, %s2049_s16  }
  0x3e   : > { %s1457_s4 = sshll.u32 (!%p2154_p3), %s2262_s27, 7  ;;  %s401_s5 = scalar_lea.sflag (!%p2154_p3), [#allocation4], %s2262_s27 }
  0x3f   : > { %s2266_s23 = scalar_lea.vmem (!%p2154_p3), [#allocation3], %s1457_s4 }
  0x42   : > { %2024 = dma.done.wait (%p2221_p12), %s401_s5, 2048  }
  0x43   : > { %2026 = vsyncadd (%p2221_p12), %s401_s5, 4294965248 }
  0x44   : > { %2028 = dma.done.wait (%p51_p1), [#allocation7], 1152  }
  0x45   : > { %2030 = vsyncadd (%p51_p1), [#allocation7], 4294966144 }
  0x46   : > { %2032 = dma.done.wait (%p51_p1), [#allocation10], 1040  }
  0x47   : > { %2034 = vsyncadd (%p51_p1), [#allocation10], 4294966256 }
  0x48   : > { %2036 = dma.done.wait (%p51_p1), [#allocation13], 32  }
  0x49   : > { %2038 = vsyncadd (%p51_p1), [#allocation13], 4294967264  ;;  %v2285_v0 = vld [vmem:[%s2266_s23 + $0x3c] sm:$0xff]   ;;  %v488_v2 = vld [vmem:[%s2266_s23 + $0x34] sm:$0xff]   ;;  %s1248_s28 = sld [smem:[#allocation2]]  ;;  %s1464_s26 = sshll.u32 %s2262_s27, 1 }
  0x4a   : > { %v1623_v1 = vld [vmem:[#allocation8 + $0x38] sm:$0xff]  ;;  %v521_v3 = vunpack.c.l.bf16 %v2285_v0  ;;  %v1622_v4 = vld [vmem:[#allocation8 + $0x30] sm:$0xff]  ;;  %v520_v5 = vunpack.c.h.bf16 %v488_v2  ;;  %v1621_v6 = vld [vmem:[#allocation8 + $0x28] sm:$0xff]  ;;  %v519_v7 = vunpack.c.l.bf16 %v488_v2  ;;  %s1596_s11 = sshll.u32 %s2149_s21, 1  ;;  %s471_s21 = scalar_lea.vmem [#allocation15], %s1464_s26  ;;  %vm1293_vm7 = vcmask 1040384  }
  0x4b   : > { %1632 = vmatpush.bf16.msra.mxu2 %v1623_v1  ;;  %v486_v8 = vld [vmem:[%s2266_s23 + $0x2c] sm:$0xff]   ;;  %v1619_v11 = vld [vmem:[#allocation8 + $0x18] sm:$0xff]  ;;  %v1618_v14 = vld [vmem:[#allocation8 + $0x10] sm:$0xff]  ;;  %s1312_s12 = scalar_lea.hbm %s2588_s10, %s1596_s11  ;;  %s1314_s13 = sshll.u32 %s471_s21, 4  ;;  %s1315_s13 = int_to_ptr.vmem [resolvable:$true] %s1314_s13 }
  0x4c   : > { %539 = vmatpush.xpose.msra.mxu0 %v521_v3  ;;  %v1620_v9 = vld [vmem:[#allocation8 + $0x20] sm:$0xff]  ;;  %v518_v10 = vunpack.c.h.bf16 %v486_v8  ;;  %v517_v12 = vunpack.c.l.bf16 %v486_v8  ;;  %v1617_v16 = vld [vmem:[#allocation8 + $0x8] sm:$0xff]  ;;  %v482_v18 = vld [vmem:[%s2266_s23 + $0x1c] sm:$0xff]   ;;  %s1316_s24 = sshll.u32 %s1312_s12, 4  ;;  %s1302_s4 = scalar_lea.sflag [#allocation5], %s2262_s27  ;;  %s1317_s24 = int_to_ptr.hbm [resolvable:$true] %s1316_s24 }
  0x4d   : > { %v484_v13 = vld [vmem:[%s2266_s23 + $0x24] sm:$0xff]   ;;  %v514_v20 = vunpack.c.h.bf16 %v482_v18  ;;  %v513_v22 = vunpack.c.l.bf16 %v482_v18  ;;  %v480_v23 = vld [vmem:[%s2266_s23 + $0x14] sm:$0xff]   ;;  %v478_v26 = vld [vmem:[%s2266_s23 + $0xc] sm:$0xff]   ;;  %s1993_s5 = sshra.s32 %s1317_s24, 4  ;;  %s1999_s22 = scalar_lea.hbm %s2588_s10, 4  ;;  %s1994_s5 = int_to_ptr.hbm [resolvable:$true] %s1993_s5 }
  0x4e   : > { %v516_v15 = vunpack.c.h.bf16 %v484_v13  ;;  %v515_v17 = vunpack.c.l.bf16 %v484_v13  ;;  %v1616_v19 = vld [vmem:[#allocation8] sm:$0xff]  ;;  %v512_v24 = vunpack.c.h.bf16 %v480_v23  ;;  %v511_v25 = vunpack.c.l.bf16 %v480_v23  ;;  %v1606_v28 = vld [vmem:[%s2266_s23 + $0x30] sm:$0xff]  ;;  %v474_v33 = vld [vmem:[%s2266_s23] sm:$0xf]  ;;  %p2000_p12 = scmp.lt.s32.totalorder %s1994_s5, %s2588_s10 }
  0x4f   : > { %1633 = vmatpush.bf16.msra.mxu2 %v1622_v4  ;;  %v1605_v21 = vld [vmem:[%s2266_s23 + $0x28] sm:$0xff]  ;;  %v510_v27 = vunpack.c.h.bf16 %v478_v26  ;;  %v509_v29 = vunpack.c.l.bf16 %v478_v26  ;;  %v506_v34 = vunpack.c.l.bf16 %v474_v33  ;;  %v1607_v35 = vld [vmem:[%s2266_s23 + $0x38] sm:$0xff]  ;;  %v2299_v36 = vld [vmem:[#allocation6] sm:$0xff] }
  0x50   : > { %540 = vmatpush.xpose.msra.mxu0 %v520_v5  ;;  %v476_v30 = vld [vmem:[%s2266_s23 + $0x4] sm:$0xff]   ;;  %v1610_v41 = vld [vmem:[%s2266_s23 + $0x50] sm:$0xff]  ;;  %v505_v42 = vld [vmem:[%s2266_s23 + $0x78] sm:$0xff]  }
  0x51   : > { %v508_v31 = vunpack.c.h.bf16 %v476_v30  ;;  %v507_v32 = vunpack.c.l.bf16 %v476_v30  ;;  %v1608_v37 = vld [vmem:[%s2266_s23 + $0x40] sm:$0xff]  ;;  %v1609_v39 = vld [vmem:[%s2266_s23 + $0x48] sm:$0xff]  ;;  %v537_v43 = vunpack.c.h.bf16 %v505_v42  ;;  %v536_v44 = vunpack.c.l.bf16 %v505_v42  ;;  %v503_v46 = vld [vmem:[%s2266_s23 + $0x70] sm:$0xff]  }
  0x52   : > { %v1600_v38 = vld [vmem:[%s2266_s23] sm:$0xff]  ;;  %v1601_v40 = vld [vmem:[%s2266_s23 + $0x8] sm:$0xff]  ;;  %v535_v48 = vunpack.c.h.bf16 %v503_v46  ;;  %v534_v49 = vunpack.c.l.bf16 %v503_v46  ;;  %v1602_v50 = vld [vmem:[%s2266_s23 + $0x10] sm:$0xff] }
  0x53   : > { %1634 = vmatpush.bf16.msra.mxu2 %v1621_v6  ;;  %559 = vmatpush.xpose.msra.mxu1 %v537_v43  ;;  %v2308_v45 = vld [vmem:[#allocation11 + $0x38] sm:$0xff]  ;;  %v2312_v47 = vld [vmem:[#allocation11 + $0x30] sm:$0xff]  ;;  %v2316_v51 = vld [vmem:[#allocation11 + $0x28] sm:$0xff] }
  0x54   : > { %541 = vmatpush.xpose.msra.mxu0 %v519_v7  ;;  %1640 = vmatpush.bf16.msra.mxu3 %v2308_v45  ;;  %v1611_v52 = vld [vmem:[%s2266_s23 + $0x58] sm:$0xff]  ;;  %v501_v53 = vld [vmem:[%s2266_s23 + $0x68] sm:$0xff]   ;;  %v499_v58 = vld [vmem:[%s2266_s23 + $0x60] sm:$0xff]  }
  0x55   : > { %v533_v54 = vunpack.c.h.bf16 %v501_v53  ;;  %v2321_v55 = vld [vmem:[#allocation11 + $0x20] sm:$0xff]  ;;  %v532_v56 = vunpack.c.l.bf16 %v501_v53  ;;  %v2324_v57 = vld [vmem:[#allocation11 + $0x18] sm:$0xff]  ;;  %v531_v59 = vunpack.c.h.bf16 %v499_v58  ;;  %v2328_v60 = vld [vmem:[#allocation11 + $0x10] sm:$0xff]  ;;  %v530_v61 = vunpack.c.l.bf16 %v499_v58 }
  0x56   : > { %v1603_v62 = vld [vmem:[%s2266_s23 + $0x18] sm:$0xff] }
  0x57   : > { %1635 = vmatpush.bf16.msra.mxu2 %v1620_v9  ;;  %560 = vmatpush.xpose.msra.mxu1 %v536_v44  ;;  %v2332_v63 = vld [vmem:[#allocation11 + $0x8] sm:$0xff] }
  0x58   : > { %542 = vmatpush.xpose.msra.mxu0 %v518_v10  ;;  %1641 = vmatpush.bf16.msra.mxu3 %v2312_v47  ;;  %v497_v2 = vld [vmem:[%s2266_s23 + $0x58] sm:$0xff]   ;;  %v1613_v10 = vld [vmem:[%s2266_s23 + $0x68] sm:$0xff] }
  0x59   : > { %v529_v3 = vunpack.c.h.bf16 %v497_v2  ;;  %v528_v5 = vunpack.c.l.bf16 %v497_v2  ;;  %v1615_v33 = vld [vmem:[%s2266_s23 + $0x78] sm:$0xff] }
  0x5b   : > { %1636 = vmatpush.bf16.msra.mxu2 %v1619_v11  ;;  %561 = vmatpush.xpose.msra.mxu1 %v535_v48 }
  0x5c   : > { %543 = vmatpush.xpose.msra.mxu0 %v517_v12  ;;  %1642 = vmatpush.bf16.msra.mxu3 %v2316_v51 }
  0x5f   : > { %1637 = vmatpush.bf16.msra.mxu2 %v1618_v14  ;;  %562 = vmatpush.xpose.msra.mxu1 %v534_v49 }
  0x60   : > { %544 = vmatpush.xpose.msra.mxu0 %v516_v15  ;;  %1643 = vmatpush.bf16.msra.mxu3 %v2321_v55  ;;  %v2344_v15 = vld [vmem:[%s2581_s3] ss:$0 sm:$0xff] }
  0x63   : > { %1638 = vmatpush.bf16.msra.mxu2 %v1617_v16  ;;  %563 = vmatpush.xpose.msra.mxu1 %v533_v54 }
  0x64   : > { %545 = vmatpush.xpose.msra.mxu0 %v515_v17  ;;  %1644 = vmatpush.bf16.msra.mxu3 %v2324_v57 }
  0x67   : > { %1639 = vmatpush.bf16.msra.mxu2 %v1616_v19  ;;  %564 = vmatpush.xpose.msra.mxu1 %v532_v56 }
  0x68   : > { %546 = vmatpush.xpose.msra.mxu0 %v514_v20  ;;  %1645 = vmatpush.bf16.msra.mxu3 %v2328_v60  ;;  %v522_v20 = vunpack.c.h.bf16 %v2285_v0 }
  0x6a   : > { %772 = vmatmul.bf16.vlgmr.msra.gmra.mxu2 %v1605_v21 }
  0x6b   : > { %565 = vmatpush.xpose.msra.mxu1 %v531_v59 }
  0x6c   : > { %547 = vmatpush.xpose.msra.mxu0 %v513_v22  ;;  %1646 = vmatpush.bf16.msra.mxu3 %v2332_v63 }
  0x6f   : > { %566 = vmatpush.xpose.msra.mxu1 %v530_v61 }
  0x70   : > { %548 = vmatpush.xpose.msra.mxu0 %v512_v24  ;;  %v1614_v24 = vld [vmem:[%s2266_s23 + $0x70] sm:$0xff] }
  0x73   : > { %567 = vmatpush.xpose.msra.mxu1 %v529_v3 }
  0x74   : > { %549 = vmatpush.xpose.msra.mxu0 %v511_v25 }
  0x77   : > { %568 = vmatpush.xpose.msra.mxu1 %v528_v5 }
  0x78   : > { %550 = vmatpush.xpose.msra.mxu0 %v510_v27 }
  0x7a   : > { %777 = vmatmul.bf16.gmra.mxu2 %v1606_v28 }
  0x7c   : > { %551 = vmatpush.xpose.msra.mxu0 %v509_v29 }
  0x80   : > { %552 = vmatpush.xpose.msra.mxu0 %v508_v31 }
  0x84   : > { %553 = vmatpush.xpose.msra.mxu0 %v507_v32 }
  0x88   : > { %554 = vmatpush.xpose.msra.mxu0 %v506_v34 }
  0x8a   : > { %782 = vmatmul.bf16.gmra.mxu2 %v1607_v35 }
  0x8b   : > { %555 = vmatmul.f32.vlgmr.msra.gmra.mxu0 %v2299_v36 }
  0x8c   : > { %739 = vmatpush.bf16.msrb.mxu0 %v1623_v1  ;;  %v1612_v1 = vld [vmem:[%s2266_s23 + $0x60] sm:$0xff] }
  0x90   : > { %740 = vmatpush.bf16.msrb.mxu0 %v1622_v4  ;;  %v1624_v4 = vld [vmem:[#allocation11] sm:$0xff] }
  0x91   : > { %1647 = vmatpush.bf16.msra.mxu3 %v1624_v4 }
  0x94   : > { %741 = vmatpush.bf16.msrb.mxu0 %v1621_v6  ;;  %v495_v6 = vld [vmem:[%s2266_s23 + $0x50] sm:$0xff]  }
  0x95   : > { %v527_v7 = vunpack.c.h.bf16 %v495_v6  ;;  %v526_v8 = vunpack.c.l.bf16 %v495_v6 }
  0x97   : > { %569 = vmatpush.xpose.msra.mxu1 %v527_v7 }
  0x98   : > { %742 = vmatpush.bf16.msrb.mxu0 %v1620_v9  ;;  %v1604_v9 = vld [vmem:[%s2266_s23 + $0x20] sm:$0xff] }
  0x9a   : > { %787 = vmatmul.bf16.gmra.mxu2 %v1608_v37 }
  0x9b   : > { %570 = vmatpush.xpose.msra.mxu1 %v526_v8 }
  0x9c   : > { %743 = vmatpush.bf16.msrb.mxu0 %v1619_v11  ;;  %v493_v11 = vld [vmem:[%s2266_s23 + $0x48] sm:$0xff]  }
  0x9d   : > { %v525_v12 = vunpack.c.h.bf16 %v493_v11  ;;  %v524_v13 = vunpack.c.l.bf16 %v493_v11 }
  0x9f   : > { %571 = vmatpush.xpose.msra.mxu1 %v525_v12 }
  0xa0   : > { %744 = vmatpush.bf16.msrb.mxu0 %v1618_v14 }
  0xa3   : > { %572 = vmatpush.xpose.msra.mxu1 %v524_v13 }
  0xa4   : > { %745 = vmatpush.bf16.msrb.mxu0 %v1617_v16  ;;  %v491_v16 = vld [vmem:[%s2266_s23 + $0x44] sm:$0xf]  ;;  %s1995_s23 = scalar_lea.hbm %s1994_s5, 2 }
  0xa5   : > { %v523_v17 = vunpack.c.l.bf16 %v491_v16  ;;  %p1996_p1 = scmp.ne.s32.totalorder %s1994_s5, %s1995_s23  ;;  %p2001_p7 = scmp.lt.s32.totalorder %s1999_s22, %s1995_s23 }
  0xa7   : > { %573 = vmatpush.xpose.msra.mxu1 %v523_v17  ;;  %p1997_p3 = pnand %p1996_p1, %p2228_p5  ;;  %p2002_p8 = por %p2001_p7, %p2000_p12 }
  0xa8   : > { %746 = vmatpush.bf16.msrb.mxu0 %v1616_v19  ;;  %v2348_v19 = vld [vmem:[#allocation9] ss:$0 sm:$0xff] }
  0xa9   : > { %p1998_p4 = pneg %p1997_p3 }
  0xaa   : > { %792 = vmatmul.bf16.gmra.mxu2 %v1609_v39 }
  0xab   : > { %747 = vmatmul.bf16.vlgmr.msrb.gmra.mxu0 %v1600_v38  ;;  %574 = vmatpush.xpose.msra.mxu1 %v522_v20  ;;  %p2003_p9 = pnand %p2002_p8, %p1998_p4 }
  0xae   : > { %575 = vmatmul.f32.vlgmr.msra.gmra.mxu1 %v2299_v36 }
  0xaf   : > { %1012 = vmatpush.bf16.msrb.mxu1 %v2308_v45 }
  0xb3   : > { %1013 = vmatpush.bf16.msrb.mxu1 %v2312_v47 }
  0xb7   : > { %1014 = vmatpush.bf16.msrb.mxu1 %v2316_v51 }
  0xba   : > { %797 = vmatmul.bf16.gmra.mxu2 %v1610_v41 }
  0xbb   : > { %752 = vmatmul.bf16.gmra.mxu0 %v1601_v40  ;;  %1015 = vmatpush.bf16.msrb.mxu1 %v2321_v55 }
  0xbf   : > { %1016 = vmatpush.bf16.msrb.mxu1 %v2324_v57 }
  0xc3   : > { %1017 = vmatpush.bf16.msrb.mxu1 %v2328_v60 }
  0xc7   : > { %1018 = vmatpush.bf16.msrb.mxu1 %v2332_v63 }
  0xca   : > { %802 = vmatmul.bf16.gmra.mxu2 %v1611_v52 }
  0xcb   : > { %757 = vmatmul.bf16.gmra.mxu0 %v1602_v50  ;;  %1019 = vmatpush.bf16.msrb.mxu1 %v1624_v4 }
  0xda   : > { %807 = vmatmul.bf16.gmra.mxu2 %v1612_v1 }
  0xdb   : > { %762 = vmatmul.bf16.gmra.mxu0 %v1603_v62 }
  0xea   : > { %812 = vmatmul.bf16.gmra.mxu2 %v1613_v10 }
  0xeb   : > { %767 = vmatmul.bf16.gmra.mxu0 %v1604_v9 }
  0xed   : > { %v773_v14 = vpop.f32.mrf.mxu2 }
  0xee   : > { %v842_v18 = vmul.f32 %v2344_v15, %v773_v14 }
  0xf0   : > { %v878_v22 = vadd.f32 %v2348_v19, %v842_v18 }
  0xf2   : > { %v910_v26 = vmax.f32 %v878_v22, 0.0 }
  0xf5   : > { %v775_v21 = vpop.f32.mrf.mxu2 }
  0xf6   : > { %v843_v23 = vmul.f32 %v2344_v15, %v775_v21 }
  0xf8   : > { %v879_v25 = vadd.f32 %v2348_v19, %v843_v23 }
  0xfa   : > { %v911_v27 = vmax.f32 %v879_v25, 0.0  ;;  %817 = vmatmul.bf16.gmra.mxu2 %v1614_v24 }
  0xfc   : > { %v937_v0 = vpack.c.bf16 %v911_v27, %v910_v26 }
  0xfd   : > { %v778_v28 = vpop.f32.mrf.mxu2 }
  0xfe   : > { %1045 = vmatmul.bf16.vlgmr.msra.gmra.mxu3 %v937_v0  ;;  %v844_v29 = vmul.f32 %v2344_v15, %v778_v28 }
 0x100   : > { %v880_v31 = vadd.f32 %v2348_v19, %v844_v29 }
 0x102   : > { %v912_v35 = vmax.f32 %v880_v31, 0.0 }
 0x105   : > { %v780_v30 = vpop.f32.mrf.mxu2 }
 0x106   : > { %v845_v32 = vmul.f32 %v2344_v15, %v780_v30 }
 0x108   : > { %v881_v34 = vadd.f32 %v2348_v19, %v845_v32  ;;  %v2372_v46 = vpop.f32.mrf.mxu0 }
 0x10a   : > { %v913_v36 = vmax.f32 %v881_v34, 0.0  ;;  %822 = vmatmul.bf16.gmra.mxu2 %v1615_v33 }
 0x10c   : > { %v938_v37 = vpack.c.bf16 %v913_v36, %v912_v35 }
 0x10d   : > { %v783_v38 = vpop.f32.mrf.mxu2 }
 0x10e   : > { %1050 = vmatmul.bf16.gmra.mxu3 %v938_v37  ;;  %v846_v39 = vmul.f32 %v2344_v15, %v783_v38 }
 0x110   : > { %v882_v41 = vadd.f32 %v2348_v19, %v846_v39 }
 0x112   : > { %v914_v44 = vmax.f32 %v882_v41, 0.0 }
 0x115   : > { %v785_v40 = vpop.f32.mrf.mxu2 }
 0x116   : > { %v847_v42 = vmul.f32 %v2344_v15, %v785_v40 }
 0x118   : > { %v883_v43 = vadd.f32 %v2348_v19, %v847_v42 }
 0x11a   : > { %v915_v45 = vmax.f32 %v883_v43, 0.0 }
 0x11c   : > { %v939_v47 = vpack.c.bf16 %v915_v45, %v914_v44 }
 0x11d   : > { %v788_v48 = vpop.f32.mrf.mxu2 }
 0x11e   : > { %1055 = vmatmul.bf16.gmra.mxu3 %v939_v47  ;;  %v848_v49 = vmul.f32 %v2344_v15, %v788_v48 }
 0x120   : > { %v884_v52 = vadd.f32 %v2348_v19, %v848_v49 }
 0x122   : > { %v916_v56 = vmax.f32 %v884_v52, 0.0 }
 0x125   : > { %v790_v51 = vpop.f32.mrf.mxu2 }
 0x126   : > { %v849_v53 = vmul.f32 %v2344_v15, %v790_v51 }
 0x128   : > { %v748_v50 = vpop.f32.mrf.mxu0  ;;  %v885_v55 = vadd.f32 %v2348_v19, %v849_v53 }
 0x129   : > { %v832_v54 = vmul.f32 %v2344_v15, %v748_v50 }
 0x12a   : > { %v917_v57 = vmax.f32 %v885_v55, 0.0 }
 0x12b   : > { %v868_v58 = vadd.f32 %v2348_v19, %v832_v54 }
 0x12c   : > { %v940_v59 = vpack.c.bf16 %v917_v57, %v916_v56 }
 0x12d   : > { %v793_v61 = vpop.f32.mrf.mxu2  ;;  %v900_v63 = vmax.f32 %v868_v58, 0.0 }
 0x12e   : > { %1060 = vmatmul.bf16.gmra.mxu3 %v940_v59  ;;  %v850_v3 = vmul.f32 %v2344_v15, %v793_v61 }
 0x130   : > { %v750_v60 = vpop.f32.mrf.mxu0  ;;  %v886_v7 = vadd.f32 %v2348_v19, %v850_v3 }
 0x131   : > { %v833_v62 = vmul.f32 %v2344_v15, %v750_v60 }
 0x132   : > { %v918_v11 = vmax.f32 %v886_v7, 0.0 }
 0x133   : > { %v869_v1 = vadd.f32 %v2348_v19, %v833_v62 }
 0x135   : > { %v901_v2 = vmax.f32 %v869_v1, 0.0  ;;  %v795_v6 = vpop.f32.mrf.mxu2 }
 0x136   : > { %v851_v8 = vmul.f32 %v2344_v15, %v795_v6 }
 0x137   : > { %v932_v4 = vpack.c.bf16 %v901_v2, %v900_v63 }
 0x138   : > { %v753_v5 = vpop.f32.mrf.mxu0  ;;  %v887_v10 = vadd.f32 %v2348_v19, %v851_v8 }
 0x139   : > { %1020 = vmatmul.bf16.vlgmr.msrb.gmra.mxu1 %v932_v4  ;;  %v834_v9 = vmul.f32 %v2344_v15, %v753_v5 }
 0x13a   : > { %v919_v12 = vmax.f32 %v887_v10, 0.0 }
 0x13b   : > { %v870_v13 = vadd.f32 %v2348_v19, %v834_v9 }
 0x13c   : > { %v941_v14 = vpack.c.bf16 %v919_v12, %v918_v11 }
 0x13d   : > { %v798_v17 = vpop.f32.mrf.mxu2  ;;  %v902_v20 = vmax.f32 %v870_v13, 0.0 }
 0x13e   : > { %1065 = vmatmul.bf16.gmra.mxu3 %v941_v14  ;;  %v852_v23 = vmul.f32 %v2344_v15, %v798_v17 }
 0x140   : > { %v755_v16 = vpop.f32.mrf.mxu0  ;;  %v888_v27 = vadd.f32 %v2348_v19, %v852_v23 }
 0x141   : > { %v835_v18 = vmul.f32 %v2344_v15, %v755_v16 }
 0x142   : > { %v920_v30 = vmax.f32 %v888_v27, 0.0 }
 0x143   : > { %v871_v21 = vadd.f32 %v2348_v19, %v835_v18 }
 0x145   : > { %v903_v22 = vmax.f32 %v871_v21, 0.0  ;;  %v800_v26 = vpop.f32.mrf.mxu2 }
 0x146   : > { %v853_v0 = vmul.f32 %v2344_v15, %v800_v26 }
 0x147   : > { %v933_v24 = vpack.c.bf16 %v903_v22, %v902_v20 }
 0x148   : > { %v758_v25 = vpop.f32.mrf.mxu0  ;;  %v889_v29 = vadd.f32 %v2348_v19, %v853_v0 }
 0x149   : > { %1025 = vmatmul.bf16.gmra.mxu1 %v933_v24  ;;  %v836_v28 = vmul.f32 %v2344_v15, %v758_v25 }
 0x14a   : > { %v921_v31 = vmax.f32 %v889_v29, 0.0 }
 0x14b   : > { %v872_v32 = vadd.f32 %v2348_v19, %v836_v28 }
 0x14c   : > { %v942_v33 = vpack.c.bf16 %v921_v31, %v920_v30 }
 0x14d   : > { %v803_v35 = vpop.f32.mrf.mxu2  ;;  %v904_v37 = vmax.f32 %v872_v32, 0.0 }
 0x14e   : > { %1070 = vmatmul.bf16.gmra.mxu3 %v942_v33  ;;  %v854_v40 = vmul.f32 %v2344_v15, %v803_v35 }
 0x150   : > { %v760_v34 = vpop.f32.mrf.mxu0  ;;  %v890_v44 = vadd.f32 %v2348_v19, %v854_v40 }
 0x151   : > { %v837_v36 = vmul.f32 %v2344_v15, %v760_v34 }
 0x152   : > { %v922_v49 = vmax.f32 %v890_v44, 0.0 }
 0x153   : > { %v873_v38 = vadd.f32 %v2348_v19, %v837_v36 }
 0x155   : > { %v905_v39 = vmax.f32 %v873_v38, 0.0  ;;  %v805_v43 = vpop.f32.mrf.mxu2 }
 0x156   : > { %v855_v45 = vmul.f32 %v2344_v15, %v805_v43 }
 0x157   : > { %v934_v41 = vpack.c.bf16 %v905_v39, %v904_v37 }
 0x158   : > { %v763_v42 = vpop.f32.mrf.mxu0  ;;  %v891_v48 = vadd.f32 %v2348_v19, %v855_v45 }
 0x159   : > { %1030 = vmatmul.bf16.gmra.mxu1 %v934_v41  ;;  %v838_v47 = vmul.f32 %v2344_v15, %v763_v42 }
 0x15a   : > { %v923_v50 = vmax.f32 %v891_v48, 0.0  ;;  %v2426_v48 = vld [vmem:[#allocation12] ss:$0 sm:$0xff] }
 0x15b   : > { %v874_v51 = vadd.f32 %v2348_v19, %v838_v47 }
 0x15c   : > { %v943_v52 = vpack.c.bf16 %v923_v50, %v922_v49  ;;  %v2428_v50 = vpop.f32.mrf.mxu1 }
 0x15d   : > { %v808_v54 = vpop.f32.mrf.mxu2  ;;  %v906_v56 = vmax.f32 %v874_v51, 0.0  ;;  %v2430_v51 = vld [vmem:[#allocation14] ss:$0 sm:$0xff] }
 0x15e   : > { %1075 = vmatmul.bf16.gmra.mxu3 %v943_v52  ;;  %v856_v59 = vmul.f32 %v2344_v15, %v808_v54 }
 0x160   : > { %v765_v53 = vpop.f32.mrf.mxu0  ;;  %v892_v63 = vadd.f32 %v2348_v19, %v856_v59 }
 0x161   : > { %v839_v55 = vmul.f32 %v2344_v15, %v765_v53 }
 0x162   : > { %v924_v4 = vmax.f32 %v892_v63, 0.0 }
 0x163   : > { %v875_v57 = vadd.f32 %v2348_v19, %v839_v55 }
 0x165   : > { %v907_v58 = vmax.f32 %v875_v57, 0.0  ;;  %v810_v62 = vpop.f32.mrf.mxu2 }
 0x166   : > { %v857_v1 = vmul.f32 %v2344_v15, %v810_v62 }
 0x167   : > { %v935_v60 = vpack.c.bf16 %v907_v58, %v906_v56 }
 0x168   : > { %v768_v61 = vpop.f32.mrf.mxu0  ;;  %v893_v3 = vadd.f32 %v2348_v19, %v857_v1 }
 0x169   : > { %1035 = vmatmul.bf16.gmra.mxu1 %v935_v60  ;;  %v840_v2 = vmul.f32 %v2344_v15, %v768_v61 }
 0x16a   : > { %v925_v5 = vmax.f32 %v893_v3, 0.0 }
 0x16b   : > { %v876_v6 = vadd.f32 %v2348_v19, %v840_v2 }
 0x16c   : > { %v944_v7 = vpack.c.bf16 %v925_v5, %v924_v4 }
 0x16d   : > { %v813_v9 = vpop.f32.mrf.mxu2  ;;  %v908_v11 = vmax.f32 %v876_v6, 0.0 }
 0x16e   : > { %1080 = vmatmul.bf16.gmra.mxu3 %v944_v7  ;;  %v858_v14 = vmul.f32 %v2344_v15, %v813_v9 }
 0x170   : > { %v770_v8 = vpop.f32.mrf.mxu0  ;;  %v894_v18 = vadd.f32 %v2348_v19, %v858_v14 }
 0x171   : > { %v841_v10 = vmul.f32 %v2344_v15, %v770_v8 }
 0x172   : > { %v926_v22 = vmax.f32 %v894_v18, 0.0 }
 0x173   : > { %v877_v12 = vadd.f32 %v2348_v19, %v841_v10 }
 0x175   : > { %v909_v13 = vmax.f32 %v877_v12, 0.0  ;;  %v815_v17 = vpop.f32.mrf.mxu2 }
 0x176   : > { %v859_v20 = vmul.f32 %v2344_v15, %v815_v17 }
 0x177   : > { %v936_v16 = vpack.c.bf16 %v909_v13, %v908_v11 }
 0x178   : > { %v895_v21 = vadd.f32 %v2348_v19, %v859_v20 }
 0x179   : > { %1040 = vmatmul.bf16.gmra.mxu1 %v936_v16 }
 0x17a   : > { %v927_v23 = vmax.f32 %v895_v21, 0.0 }
 0x17c   : > { %v945_v24 = vpack.c.bf16 %v927_v23, %v926_v22 }
 0x17d   : > { %v818_v25 = vpop.f32.mrf.mxu2 }
 0x17e   : > { %1085 = vmatmul.bf16.gmra.mxu3 %v945_v24  ;;  %v860_v27 = vmul.f32 %v2344_v15, %v818_v25 }
 0x180   : > { %v896_v28 = vadd.f32 %v2348_v19, %v860_v27 }
 0x181   : > { %v1046_v26 = vpop.f32.mrf.mxu3 }
 0x182   : > { %v928_v32 = vmax.f32 %v896_v28, 0.0  ;;  %v1115_v2 = vmul.f32 %v2426_v48, %v1046_v26 }
 0x184   : > { %v1151_v6 = vadd.f32 %v2430_v51, %v1115_v2 }
 0x185   : > { %v820_v0 = vpop.f32.mrf.mxu2 }
 0x186   : > { %v861_v29 = vmul.f32 %v2344_v15, %v820_v0  ;;  %v1183_v9 = vmax.f32 %v1151_v6, 0.0 }
 0x188   : > { %v897_v30 = vadd.f32 %v2348_v19, %v861_v29 }
 0x189   : > { %v1048_v31 = vpop.f32.mrf.mxu3 }
 0x18a   : > { %v929_v33 = vmax.f32 %v897_v30, 0.0  ;;  %v1116_v61 = vmul.f32 %v2426_v48, %v1048_v31 }
 0x18c   : > { %v946_v34 = vpack.c.bf16 %v929_v33, %v928_v32  ;;  %v1152_v3 = vadd.f32 %v2430_v51, %v1116_v61 }
 0x18d   : > { %v823_v35 = vpop.f32.mrf.mxu2 }
 0x18e   : > { %1090 = vmatmul.bf16.gmra.mxu3 %v946_v34  ;;  %v862_v37 = vmul.f32 %v2344_v15, %v823_v35  ;;  %v1184_v7 = vmax.f32 %v1152_v3, 0.0  ;;  %v2490_v3 = vld [vmem:[%s2586_s8] sm:$0xff] }
 0x190   : > { %v898_v39 = vadd.f32 %v2348_v19, %v862_v37 }
 0x191   : > { %v1051_v36 = vpop.f32.mrf.mxu3 }
 0x192   : > { %v930_v43 = vmax.f32 %v898_v39, 0.0  ;;  %v1117_v57 = vmul.f32 %v2426_v48, %v1051_v36 }
 0x194   : > { %v1153_v62 = vadd.f32 %v2430_v51, %v1117_v57 }
 0x195   : > { %v825_v38 = vpop.f32.mrf.mxu2 }
 0x196   : > { %v863_v40 = vmul.f32 %v2344_v15, %v825_v38  ;;  %v1185_v4 = vmax.f32 %v1153_v62, 0.0 }
 0x198   : > { %v899_v41 = vadd.f32 %v2348_v19, %v863_v40 }
 0x199   : > { %v1053_v42 = vpop.f32.mrf.mxu3 }
 0x19a   : > { %v931_v44 = vmax.f32 %v899_v41, 0.0  ;;  %v1118_v19 = vmul.f32 %v2426_v48, %v1053_v42 }
 0x19c   : > { %v947_v45 = vpack.c.bf16 %v931_v44, %v930_v43  ;;  %v1154_v58 = vadd.f32 %v2430_v51, %v1118_v19 }
 0x19e   : > { %1095 = vmatmul.bf16.gmra.mxu3 %v947_v45  ;;  %v1186_v63 = vmax.f32 %v1154_v58, 0.0 }
 0x1a1   : > { %v1056_v47 = vpop.f32.mrf.mxu3 }
 0x1a2   : > { %v1119_v52 = vmul.f32 %v2426_v48, %v1056_v47 }
 0x1a4   : > { %v1155_v54 = vadd.f32 %v2430_v51, %v1119_v52 }
 0x1a6   : > { %v1187_v59 = vmax.f32 %v1155_v54, 0.0 }
 0x1a9   : > { %v1058_v49 = vpop.f32.mrf.mxu3 }
 0x1aa   : > { %v1120_v53 = vmul.f32 %v2426_v48, %v1058_v49 }
 0x1ac   : > { %v1156_v15 = vadd.f32 %v2430_v51, %v1120_v53 }
 0x1ae   : > { %v1188_v55 = vmax.f32 %v1156_v15, 0.0 }
 0x1b0   : > { %1206 = vmatpush.xpose.msra.mxu0 %v1188_v55 }
 0x1b1   : > { %v2437_v56 = vpop.f32.mrf.mxu3 }
 0x1b4   : > { %1207 = vmatpush.xpose.msra.mxu0 %v1187_v59 }
 0x1b6   : > { %v2441_v60 = vpop.f32.mrf.mxu1 }
 0x1b7   : > { %v1105_v57 = vmul.f32 %v2426_v48, %v2441_v60 }
 0x1b8   : > { %1208 = vmatpush.xpose.msra.mxu0 %v1186_v63 }
 0x1b9   : > { %v2445_v1 = vpop.f32.mrf.mxu3  ;;  %v1141_v61 = vadd.f32 %v2430_v51, %v1105_v57  ;;  %v1249_v57 = vstv %s1248_s28 }
 0x1bb   : > { %v1173_v2 = vmax.f32 %v1141_v61, 0.0 }
 0x1bc   : > { %1209 = vmatpush.xpose.msra.mxu0 %v1185_v4 }
 0x1be   : > { %v1023_v5 = vpop.f32.mrf.mxu1 }
 0x1bf   : > { %v1106_v15 = vmul.f32 %v2426_v48, %v1023_v5 }
 0x1c0   : > { %1210 = vmatpush.xpose.msra.mxu0 %v1184_v7 }
 0x1c1   : > { %v2450_v8 = vpop.f32.mrf.mxu3  ;;  %v1142_v58 = vadd.f32 %v2430_v51, %v1106_v15 }
 0x1c3   : > { %v1174_v62 = vmax.f32 %v1142_v58, 0.0 }
 0x1c4   : > { %1211 = vmatpush.xpose.msra.mxu0 %v1183_v9 }
 0x1c6   : > { %v1026_v10 = vpop.f32.mrf.mxu1 }
 0x1c7   : > { %v1107_v52 = vmul.f32 %v2426_v48, %v1026_v10 }
 0x1c9   : > { %v2452_v11 = vpop.f32.mrf.mxu3  ;;  %v1143_v19 = vadd.f32 %v2430_v51, %v1107_v52 }
 0x1cb   : > { %v1175_v59 = vmax.f32 %v1143_v19, 0.0 }
 0x1ce   : > { %v1028_v12 = vpop.f32.mrf.mxu1 }
 0x1cf   : > { %v1108_v45 = vmul.f32 %v2426_v48, %v1028_v12 }
 0x1d1   : > { %v2454_v13 = vpop.f32.mrf.mxu3  ;;  %v1144_v53 = vadd.f32 %v2430_v51, %v1108_v45 }
 0x1d3   : > { %v1176_v54 = vmax.f32 %v1144_v53, 0.0 }
 0x1d6   : > { %v1031_v14 = vpop.f32.mrf.mxu1 }
 0x1d7   : > { %v1109_v40 = vmul.f32 %v2426_v48, %v1031_v14 }
 0x1d9   : > { %v2456_v16 = vpop.f32.mrf.mxu3  ;;  %v1145_v43 = vadd.f32 %v2430_v51, %v1109_v40 }
 0x1db   : > { %v1177_v49 = vmax.f32 %v1145_v43, 0.0 }
 0x1de   : > { %v1033_v17 = vpop.f32.mrf.mxu1 }
 0x1df   : > { %v1110_v36 = vmul.f32 %v2426_v48, %v1033_v17 }
 0x1e1   : > { %v2458_v18 = vpop.f32.mrf.mxu3  ;;  %v1146_v41 = vadd.f32 %v2430_v51, %v1110_v36 }
 0x1e3   : > { %v1178_v44 = vmax.f32 %v1146_v41, 0.0 }
 0x1e6   : > { %v1036_v20 = vpop.f32.mrf.mxu1 }
 0x1e7   : > { %v1111_v33 = vmul.f32 %v2426_v48, %v1036_v20 }
 0x1e9   : > { %v2460_v21 = vpop.f32.mrf.mxu3  ;;  %v1147_v37 = vadd.f32 %v2430_v51, %v1111_v33 }
 0x1eb   : > { %v1179_v42 = vmax.f32 %v1147_v37, 0.0 }
 0x1ee   : > { %v1038_v22 = vpop.f32.mrf.mxu1 }
 0x1ef   : > { %v1112_v28 = vmul.f32 %v2426_v48, %v1038_v22 }
 0x1f1   : > { %v2462_v23 = vpop.f32.mrf.mxu3  ;;  %v1148_v34 = vadd.f32 %v2430_v51, %v1112_v28 }
 0x1f3   : > { %v1180_v38 = vmax.f32 %v1148_v34, 0.0 }
 0x1f6   : > { %v1041_v24 = vpop.f32.mrf.mxu1 }
 0x1f7   : > { %v1113_v26 = vmul.f32 %v2426_v48, %v1041_v24 }
 0x1f9   : > { %v2464_v25 = vpop.f32.mrf.mxu3  ;;  %v1149_v29 = vadd.f32 %v2430_v51, %v1113_v26 }
 0x1fa   : > { %v1130_v28 = vmul.f32 %v2426_v48, %v2464_v25  ;;  %v1127_v25 = vmul.f32 %v2426_v48, %v2458_v18  ;;  %v1124_v18 = vmul.f32 %v2426_v48, %v2452_v11  ;;  %v1121_v11 = vmul.f32 %v2426_v48, %v2437_v56 }
 0x1fb   : > { %v1181_v35 = vmax.f32 %v1149_v29, 0.0 }
 0x1fc   : > { %v1166_v33 = vadd.f32 %v2430_v51, %v1130_v28  ;;  %v1160_v45 = vadd.f32 %v2430_v51, %v1124_v18 }
 0x1fe   : > { %v1043_v27 = vpop.f32.mrf.mxu1  ;;  %v1198_v36 = vmax.f32 %v1166_v33, 0.0  ;;  %v1192_v52 = vmax.f32 %v1160_v45, 0.0 }
 0x1ff   : > { %v1114_v0 = vmul.f32 %v2426_v48, %v1043_v27 }
 0x201   : > { %v1150_v30 = vadd.f32 %v2430_v51, %v1114_v0  ;;  %v1086_v32 = vpop.f32.mrf.mxu3 }
 0x202   : > { %v1131_v26 = vmul.f32 %v2426_v48, %v1086_v32  ;;  %v1128_v32 = vmul.f32 %v2426_v48, %v2460_v21  ;;  %v1125_v21 = vmul.f32 %v2426_v48, %v2454_v13  ;;  %v1122_v13 = vmul.f32 %v2426_v48, %v2445_v1 }
 0x203   : > { %v1182_v31 = vmax.f32 %v1150_v30, 0.0 }
 0x204   : > { %v1167_v29 = vadd.f32 %v2430_v51, %v1131_v26  ;;  %v1164_v37 = vadd.f32 %v2430_v51, %v1128_v32  ;;  %v1161_v43 = vadd.f32 %v2430_v51, %v1125_v21  ;;  %v1158_v53 = vadd.f32 %v2430_v51, %v1122_v13 }
 0x205   : > { %1212 = vmatpush.xpose.msra.mxu0 %v1182_v31  ;;  %v1129_v31 = vmul.f32 %v2426_v48, %v2462_v23  ;;  %v1126_v23 = vmul.f32 %v2426_v48, %v2456_v16  ;;  %v1123_v16 = vmul.f32 %v2426_v48, %v2450_v8  ;;  %v1157_v8 = vadd.f32 %v2430_v51, %v1121_v11 }
 0x206   : > { %v1199_v34 = vmax.f32 %v1167_v29, 0.0  ;;  %v1196_v40 = vmax.f32 %v1164_v37, 0.0  ;;  %v1190_v19 = vmax.f32 %v1158_v53, 0.0  ;;  %v1296_v26 = vlaneseq }
 0x207   : > { %v1162_v41 = vadd.f32 %v2430_v51, %v1126_v23 }
 0x208   : > { %vm1298_vm9 = vcmp.lt.s32.totalorder %v1296_v26, 256 }
 0x209   : > { %1213 = vmatpush.xpose.msra.mxu0 %v1181_v35  ;;  %v1088_v39 = vpop.f32.mrf.mxu3  ;;  %v1165_v35 = vadd.f32 %v2430_v51, %v1129_v31 }
 0x20a   : > { %v1132_v20 = vmul.f32 %v2426_v48, %v1088_v39  ;;  %v1163_v39 = vadd.f32 %v2430_v51, %v1127_v25 }
 0x20c   : > { %v1168_v27 = vadd.f32 %v2430_v51, %v1132_v20 }
 0x20d   : > { %1214 = vmatpush.xpose.msra.mxu0 %v1180_v38  ;;  %v1197_v38 = vmax.f32 %v1165_v35, 0.0 }
 0x20e   : > { %v1200_v30 = vmax.f32 %v1168_v27, 0.0 }
 0x211   : > { %1215 = vmatpush.xpose.msra.mxu0 %v1179_v42  ;;  %v1091_v47 = vpop.f32.mrf.mxu3  ;;  %v1195_v42 = vmax.f32 %v1163_v39, 0.0 }
 0x212   : > { %v1133_v12 = vmul.f32 %v2426_v48, %v1091_v47  ;;  %v1193_v47 = vmax.f32 %v1161_v43, 0.0 }
 0x214   : > { %v1169_v22 = vadd.f32 %v2430_v51, %v1133_v12 }
 0x215   : > { %1216 = vmatpush.xpose.msra.mxu0 %v1178_v44  ;;  %v1194_v44 = vmax.f32 %v1162_v41, 0.0 }
 0x216   : > { %v1201_v0 = vmax.f32 %v1169_v22, 0.0 }
 0x219   : > { %1217 = vmatpush.xpose.msra.mxu0 %v1177_v49  ;;  %v1093_v55 = vpop.f32.mrf.mxu3  ;;  %v1159_v49 = vadd.f32 %v2430_v51, %v1123_v16 }
 0x21a   : > { %v1134_v7 = vmul.f32 %v2426_v48, %v1093_v55 }
 0x21b   : > { %v1191_v15 = vmax.f32 %v1159_v49, 0.0 }
 0x21c   : > { %v1170_v14 = vadd.f32 %v2430_v51, %v1134_v7 }
 0x21d   : > { %1218 = vmatpush.xpose.msra.mxu0 %v1176_v54  ;;  %v1189_v54 = vmax.f32 %v1157_v8, 0.0 }
 0x21e   : > { %v1202_v24 = vmax.f32 %v1170_v14, 0.0 }
 0x221   : > { %1219 = vmatpush.xpose.msra.mxu0 %v1175_v59  ;;  %v1096_v63 = vpop.f32.mrf.mxu3 }
 0x222   : > { %v1135_v60 = vmul.f32 %v2426_v48, %v1096_v63 }
 0x224   : > { %v1171_v9 = vadd.f32 %v2430_v51, %v1135_v60 }
 0x225   : > { %1220 = vmatpush.xpose.msra.mxu0 %v1174_v62 }
 0x226   : > { %v1203_v17 = vmax.f32 %v1171_v9, 0.0 }
 0x229   : > { %1221 = vmatpush.xpose.msra.mxu0 %v1173_v2  ;;  %v1098_v4 = vpop.f32.mrf.mxu3 }
 0x22a   : > { %v1136_v5 = vmul.f32 %v2426_v48, %v1098_v4 }
 0x22c   : > { %1222 = vmatmul.f32.vlgmr.msra.gmra.mxu0 %v2490_v3  ;;  %v1172_v6 = vadd.f32 %v2430_v51, %v1136_v5 }
 0x22e   : > { %v1204_v10 = vmax.f32 %v1172_v6, 0.0 }
 0x230   : > { %1226 = vmatpush.xpose.msra.mxu1 %v1204_v10 }
 0x234   : > { %1227 = vmatpush.xpose.msra.mxu1 %v1203_v17 }
 0x238   : > { %1228 = vmatpush.xpose.msra.mxu1 %v1202_v24 }
 0x23c   : > { %1229 = vmatpush.xpose.msra.mxu1 %v1201_v0 }
 0x240   : > { %1230 = vmatpush.xpose.msra.mxu1 %v1200_v30 }
 0x244   : > { %1231 = vmatpush.xpose.msra.mxu1 %v1199_v34 }
 0x248   : > { %1232 = vmatpush.xpose.msra.mxu1 %v1198_v36 }
 0x24c   : > { %1233 = vmatpush.xpose.msra.mxu1 %v1197_v38 }
 0x250   : > { %1234 = vmatpush.xpose.msra.mxu1 %v1196_v40 }
 0x254   : > { %1235 = vmatpush.xpose.msra.mxu1 %v1195_v42 }
 0x258   : > { %1236 = vmatpush.xpose.msra.mxu1 %v1194_v44 }
 0x25c   : > { %1237 = vmatpush.xpose.msra.mxu1 %v1193_v47 }
 0x260   : > { %1238 = vmatpush.xpose.msra.mxu1 %v1192_v52 }
 0x264   : > { %1239 = vmatpush.xpose.msra.mxu1 %v1191_v15 }
 0x268   : > { %1240 = vmatpush.xpose.msra.mxu1 %v1190_v19 }
 0x26c   : > { %1241 = vmatpush.xpose.msra.mxu1 %v1189_v54 }
 0x26f   : > { %1242 = vmatmul.f32.vlgmr.msra.gmra.mxu1 %v2490_v3 }
 0x2a9   : > { %v1223_v1 = vpop.f32.mrf.mxu0 }
 0x2aa   : > { %v1246_v55 = vadd.f32 %v1223_v1, %v2372_v46 }
 0x2ac   : > { %v1250_v58 = vadd.f32 %v1249_v57, %v1246_v55 }
 0x2ae   : > { %v1593_v59 = vmul.f32 -1.442695, %v1250_v58 }
 0x2b0   : > { %1761 = vpow2.f32 %v1593_v59 }
 0x2b6   : > { %v1762_v48 = vpop.eup %1761 }
 0x2b7   : > { %v1258_v51 = vadd.f32 1.0, %v1762_v48 }
 0x2b9   : > { %1763 = vrcp.f32 %v1258_v51  ;;  %vm1265_vm2 = vweird.f32 %v1258_v51  ;;  %v1271_v17 = vand.u32 2147483648, %v1258_v51  ;;  %v1269_v22 = vand.u32 2147483647, %v1258_v51 }
 0x2bb   : > { %v1272_v29 = vor.u32 1.1754944e-38, %v1271_v17  ;;  %vm1270_vm8 = vcmp.eq.f32.partialorder %v1269_v22, 8.507059e+37 }
 0x2bf   : > { %v1764_v2 = vpop.eup %1763 }
 0x2c0   : > { %v1261_v60 = vmul.f32 %v1764_v2, %v1258_v51  ;;  %vm1266_vm0 = vweird.f32 %v1764_v2 }
 0x2c1   : > { %vm2543_vm4 = vmor %vm1265_vm2, %vm1266_vm0 }
 0x2c2   : > { %v1262_v46 = vsub.f32 1.0, %v1261_v60 }
 0x2c4   : > { %v1263_v6 = vmul.f32 %v1764_v2, %v1262_v46 }
 0x2c6   : > { %v1264_v12 = vadd.f32 %v1764_v2, %v1263_v6 }
 0x2c8   : > { %v1268_v0 = vsel %vm2543_vm4, %v1764_v2, %v1264_v12 }
 0x2c9   : > { %v1273_v33 = vsel %vm1270_vm8, %v1272_v29, %v1268_v0 }
 0x2ec   : > { %v1243_v56 = vpop.f32.mrf.mxu1 }
 0x2ed   : > { %v1247_v61 = vadd.f32 %v1243_v56, %v2428_v50 }
 0x2ef   : > { %v1251_v62 = vadd.f32 %v1249_v57, %v1247_v61 }
 0x2f1   : > { %v1594_v63 = vmul.f32 -1.442695, %v1251_v62 }
 0x2f3   : > { %1765 = vpow2.f32 %v1594_v63 }
 0x2f9   : > { %v1766_v3 = vpop.eup %1765 }
 0x2fa   : > { %v1259_v4 = vadd.f32 1.0, %v1766_v3 }
 0x2fc   : > { %1767 = vrcp.f32 %v1259_v4  ;;  %v1286_v50 = vand.u32 2147483648, %v1259_v4  ;;  %v1284_v14 = vand.u32 2147483647, %v1259_v4  ;;  %vm1280_vm3 = vweird.f32 %v1259_v4 }
 0x2fe   : > { %v1287_v27 = vor.u32 1.1754944e-38, %v1286_v50  ;;  %vm1285_vm6 = vcmp.eq.f32.partialorder %v1284_v14, 8.507059e+37 }
 0x302   : > { %v1768_v5 = vpop.eup %1767 }
 0x303   : > { %v1276_v7 = vmul.f32 %v1768_v5, %v1259_v4  ;;  %vm1281_vm1 = vweird.f32 %v1768_v5 }
 0x304   : > { %vm1282_vm5 = vmor %vm1280_vm3, %vm1281_vm1 }
 0x305   : > { %v1277_v9 = vsub.f32 1.0, %v1276_v7 }
 0x307   : > { %v1278_v10 = vmul.f32 %v1768_v5, %v1277_v9 }
 0x309   : > { %v1279_v24 = vadd.f32 %v1768_v5, %v1278_v10 }
 0x30b   : > { %v1283_v28 = vsel %vm1282_vm5, %v1768_v5, %v1279_v24 }
 0x30c   : > { %v1288_v30 = vsel %vm1285_vm6, %v1287_v27, %v1283_v28 }
 0x30d   : > { %v1292_v31 = vrot.slane %v1288_v30, 7 }
 0x30f   : > { %v1294_v34 = vsel %vm1293_vm7, %v1273_v33, %v1292_v31 }
 0x310   : > { %1300 = vst.msk [vmem:[%s471_s21] sm:$0x3] %vm1298_vm9, %v1294_v34 }
 0x311   : > { %2006 = shalt.err (!%p2003_p9)
}
 0x312   : > { %1674 = dma.vmem_to_hbm [thread:$0]  (%p2228_p5), %s1315_s13, 32, %s1317_s24, %s1302_s4  }
 0x313 PF: > { %s1328_s27 = sand.u32 1, %s2045_s15   ;;  %p2610_p10 = scmp.ge.s32.totalorder %s2057_s18, 2 }
 0x314   : > { %s1329_s26 = scalar_lea.sflag [#allocation5], %s1328_s27 }
 0x315   : > { %p1700_p13 = pnand %p2610_p10, %p2232_p6 }
 0x317   : > { %p1701_p11 = pneg %p1700_p13 }
 0x319   : > { %2040 = dma.done.wait (%p1701_p11), %s1329_s26, 32  }
 0x31a   : > { %2042 = vsyncadd (%p1701_p11), %s1329_s26, 4294967264  ;;  %p27_p0 = scmp.ge.s32.totalorder %s2202_s29, 4   ;;  %s2611_s15 = smov %s2049_s16 }
 0x31b   : > { %s2612_s16 = smov %s2053_s17  ;;  %s2613_s17 = smov %s2213_s30 }
 0x31c   : > { %s2614_s18 = smov %s2202_s29  ;;  %29 = sbr.rel (!%p27_p0) target bundleno = 14 (0xe), region = 129 }
 0x321   :  { %1335 = vsyncpa [#allocation4], 1 }
 0x322   :  { %1337 = vsyncpa [#allocation4 + $0x1], 1 }
 0x323   :  { %1338 = vsyncpa [#allocation7], 1 }
 0x324   :  { %1339 = vsyncpa [#allocation10], 1 }
 0x325   :  { %1340 = vsyncpa [#allocation13], 1 }
 0x326   :  { %1341 = vsyncpa [#allocation5], 1 }
 0x327   :  { %1343 = vsyncpa [#allocation5 + $0x1], 1 }

</bundles_post_ra>
